<compile_context>
chip_gen: v7x
topology: tpu7x:2x2x1
jax: 0.10.0
libtpu: 0.0.40
codegen_flags: <defaults>
</compile_context>

<pallas_src>
from functools import partial
from math import sqrt

import jax
import jax.numpy as jnp
from jax.experimental import pallas as pl
from jax.experimental.pallas import tpu as pltpu


def _round_up(x, m):
    return ((x + m - 1) // m) * m


def _pick_tile(n, desired):
    for t in (desired, 512, 256, 128, 64, 32, 16, 8):
        if t <= n and n % t == 0:
            return t
    return n  # fall back to full extent (always a legal block)


def _vmem_estimate_bytes(tq, tk, cin, c_all, cqk_pad, cout_pad):
    bf16, f32 = 2, 4
    b = 2 * tq * cin * bf16                 # x_q tile (double-buffered)
    b += 2 * tk * cin * bf16                # x_kv tile (double-buffered)
    b += 2 * 2 * cin * c_all * bf16         # packed weights [Wq|Wc], [Wk|Wv]
    b += 2 * 2 * 8 * c_all * f32            # packed biases (sublane-padded)
    b += 2 * tq * cout_pad * bf16           # output tile (double-buffered)
    b += tq * cqk_pad * bf16                # q scratch
    b += 2 * tq * cout_pad * f32            # x1 + acc scratch
    b += 2 * tq * f32                       # m, l scratch
    return b


def _self_attn1_kernel(xq_ref, xkv_ref, wqc_ref, wkv_ref, bqc_ref, bkv_ref,
                       gamma_ref, o_ref,
                       q_scr, x1_scr, m_scr, l_scr, acc_scr, *, cqk_pad):
    kv = pl.program_id(2)

    @pl.when(kv == 0)
    def _init():
        # Fused [query | conv1] projection for this q tile -- one wide GEMM,
        # executed once per (b, q-tile) and cached in VMEM scratch.
        xq = xq_ref[0]                                              # (tq, Cin) bf16
        qc = jnp.dot(xq, wqc_ref[...],
                     preferred_element_type=jnp.float32) + bqc_ref[...]
        q_scr[...] = qc[:, :cqk_pad].astype(jnp.bfloat16)           # (tq, Cqk_pad)
        x1_scr[...] = qc[:, cqk_pad:]                               # (tq, Cout_pad) f32
        m_scr[...] = jnp.full(m_scr.shape, -jnp.inf, jnp.float32)
        l_scr[...] = jnp.zeros(l_scr.shape, jnp.float32)
        acc_scr[...] = jnp.zeros(acc_scr.shape, jnp.float32)

    # Fused [key | value] projection for this kv tile -- one wide GEMM.
    xkv = xkv_ref[0]                                                # (tk, Cin) bf16
    kvp = jnp.dot(xkv, wkv_ref[...],
                  preferred_element_type=jnp.float32) + bkv_ref[...]
    k = kvp[:, :cqk_pad].astype(jnp.bfloat16)                       # (tk, Cqk_pad)
    v = kvp[:, cqk_pad:].astype(jnp.bfloat16)                       # (tk, Cout_pad)

    # energy tile: s[i, j] = q_i . k_j   (== torch.bmm(proj_query1, proj_key1))
    s = jax.lax.dot_general(q_scr[...], k, (((1,), (1,)), ((), ())),
                            preferred_element_type=jnp.float32)     # (tq, tk)

    # Online softmax over the kv axis (torch softmax(dim=-1)); f32 elementwise math.
    m_prev = m_scr[...]
    m_new = jnp.maximum(m_prev, jnp.max(s, axis=-1, keepdims=True))
    alpha = jnp.exp(m_prev - m_new)
    p = jnp.exp(s - m_new)
    l_scr[...] = alpha * l_scr[...] + jnp.sum(p, axis=-1, keepdims=True)
    acc_scr[...] = alpha * acc_scr[...] + jnp.dot(
        p.astype(jnp.bfloat16), v, preferred_element_type=jnp.float32)
    m_scr[...] = m_new

    @pl.when(kv == pl.num_programs(2) - 1)
    def _finalize():
        # out[i, :] = gamma * sum_j attn[i, j] * v[j, :] + x1[i, :]
        inv_l = pl.reciprocal(l_scr[...], approx=True)
        out = gamma_ref[0, 0] * (acc_scr[...] * inv_l) + x1_scr[...]
        o_ref[0] = out.astype(o_ref.dtype)


def self_attn1_forward(params, x_nchw, *, tile_q=128, tile_k=128):
    """Forward pass of Self_Attn1 with its default conv config (1x1, stride 1, pad 0)."""
    # TODO(synk): general ksize/stride/pad would need an im2col / shifted-window
    # front-end; the module's default (pointwise) configuration is implemented.
    B, Cin, W, H = x_nchw.shape
    N = W * H
    Cqk = params["wq"].shape[1]
    Cout = params["wv"].shape[1]

    # Lane-friendly padded channel widths (review: pad Cqk / Cout to multiples of 128).
    CQK_PAD = _round_up(max(Cqk, 1), 128)
    COUT_PAD = _round_up(max(Cout, 1), 128)
    C_ALL = CQK_PAD + COUT_PAD

    tq = _pick_tile(N, tile_q)
    tk = _pick_tile(N, tile_k)

    def pad_cols(a, to):
        return jnp.pad(a, ((0, 0), (0, to - a.shape[1])))

    # Pack the four projection weights into two wide bf16 GEMM operands (+ bias rows).
    w_qc = jnp.concatenate(
        [pad_cols(params["wq"].astype(jnp.bfloat16), CQK_PAD),
         pad_cols(params["wc"].astype(jnp.bfloat16), COUT_PAD)], axis=1)
    w_kv = jnp.concatenate(
        [pad_cols(params["wk"].astype(jnp.bfloat16), CQK_PAD),
         pad_cols(params["wv"].astype(jnp.bfloat16), COUT_PAD)], axis=1)
    b_qc = jnp.concatenate(
        [pad_cols(params["bq"].astype(jnp.float32), CQK_PAD),
         pad_cols(params["bc"].astype(jnp.float32), COUT_PAD)], axis=1)
    b_kv = jnp.concatenate(
        [pad_cols(params["bk"].astype(jnp.float32), CQK_PAD),
         pad_cols(params["bv"].astype(jnp.float32), COUT_PAD)], axis=1)
    gamma = params["gamma"].reshape(1, 1).astype(jnp.float32)

    # NCHW -> (B, N, Cin) channel-last; N flattened in torch's (w, h) order.
    x_flat = (jnp.transpose(x_nchw, (0, 2, 3, 1))
              .reshape(B, N, Cin)
              .astype(jnp.bfloat16))

    vmem_est = _vmem_estimate_bytes(tq, tk, Cin, C_ALL, CQK_PAD, COUT_PAD)
    vmem_limit = int(min(32 << 20, max(8 << 20, 4 * vmem_est)))

    kernel = partial(_self_attn1_kernel, cqk_pad=CQK_PAD)

    out_padded = pl.pallas_call(
        kernel,
        out_shape=jax.ShapeDtypeStruct((B, N, COUT_PAD), jnp.bfloat16),
        grid_spec=pltpu.PrefetchScalarGridSpec(
            num_scalar_prefetch=0,
            grid=(B, N // tq, N // tk),
            in_specs=[
                pl.BlockSpec((1, tq, Cin), lambda b, qi, ki: (b, qi, 0)),   # x (q tile)
                pl.BlockSpec((1, tk, Cin), lambda b, qi, ki: (b, ki, 0)),   # x (kv tile)
                pl.BlockSpec((Cin, C_ALL), lambda b, qi, ki: (0, 0)),       # [Wq | Wc]
                pl.BlockSpec((Cin, C_ALL), lambda b, qi, ki: (0, 0)),       # [Wk | Wv]
                pl.BlockSpec((1, C_ALL), lambda b, qi, ki: (0, 0)),         # [bq | bc]
                pl.BlockSpec((1, C_ALL), lambda b, qi, ki: (0, 0)),         # [bk | bv]
                pl.BlockSpec(memory_space=pltpu.MemorySpace.SMEM),          # gamma
            ],
            out_specs=pl.BlockSpec((1, tq, COUT_PAD), lambda b, qi, ki: (b, qi, 0)),
            scratch_shapes=[
                pltpu.VMEM((tq, CQK_PAD), jnp.bfloat16),   # q tile (resident over kv)
                pltpu.VMEM((tq, COUT_PAD), jnp.float32),   # x1 (residual) tile
                pltpu.VMEM((tq, 1), jnp.float32),          # running max  m
                pltpu.VMEM((tq, 1), jnp.float32),          # running sum  l
                pltpu.VMEM((tq, COUT_PAD), jnp.float32),   # output accumulator
            ],
        ),
        compiler_params=pltpu.CompilerParams(
            dimension_semantics=("parallel", "parallel", "arbitrary"),
            vmem_limit_bytes=vmem_limit,
        ),
    )(x_flat, x_flat, w_qc, w_kv, b_qc, b_kv, gamma)

    # (B, N, Cout_pad) -> strip channel padding -> (B, Cout, W, H) like torch.
    out = out_padded[:, :, :Cout].astype(jnp.float32)
    return out.reshape(B, W, H, Cout).transpose(0, 3, 1, 2)


# ----------------------------------------------------------------------------
# Parameters (deterministic, synthetic).  Weights are stored bf16 once here so
# no per-call casting of weight operands is needed.
# ----------------------------------------------------------------------------
def init_params(key, in_dim, out_dim, gamma=0.5):
    ks = jax.random.split(key, 8)
    qk = out_dim // 8

    def w(k, fi, fo):
        return (jax.random.normal(k, (fi, fo), jnp.float32)
                / sqrt(float(fi))).astype(jnp.bfloat16)

    def b(k, n):
        return 0.01 * jax.random.normal(k, (1, n), jnp.float32)

    return {
        "wq": w(ks[0], in_dim, qk), "bq": b(ks[1], qk),
        "wk": w(ks[2], in_dim, qk), "bk": b(ks[3], qk),
        "wv": w(ks[4], in_dim, out_dim), "bv": b(ks[5], out_dim),
        "wc": w(ks[6], in_dim, out_dim), "bc": b(ks[7], out_dim),
        # torch initializes gamma to 0; the smoke test runs both gamma=0 (pure x1
        # path, torch init) and gamma=0.5 (exercises the attention branch).
        "gamma": jnp.full((1, 1), gamma, jnp.float32),
    }


# Pure-JAX f32 reference of the same math (torch semantics) for a tolerance check.
def reference_forward(params, x_nchw):
    B, Cin, W, H = x_nchw.shape
    N = W * H
    xf = jnp.transpose(x_nchw, (0, 2, 3, 1)).reshape(B, N, Cin)
    f32 = lambda a: a.astype(jnp.float32)
    q = xf @ f32(params["wq"]) + params["bq"]
    k = xf @ f32(params["wk"]) + params["bk"]
    v = xf @ f32(params["wv"]) + params["bv"]
    x1 = xf @ f32(params["wc"]) + params["bc"]
    energy = jnp.einsum("bic,bjc->bij", q, k)
    attn = jax.nn.softmax(energy, axis=-1)
    out = jnp.einsum("bij,bjc->bic", attn, v)
    out = params["gamma"][0, 0] * out + x1
    return out.reshape(B, W, H, -1).transpose(0, 3, 1, 2)


if __name__ == "__main__":
    key = jax.random.PRNGKey(0)
    pkey, xkey = jax.random.split(key)

    B, in_dim, out_dim, W, H = 2, 64, 64, 16, 16
    x = jax.random.normal(xkey, (B, in_dim, W, H), jnp.float32)

    fwd = jax.jit(self_attn1_forward)

    # --- gamma = 0.5: attention branch exercised --------------------------------
    params = init_params(pkey, in_dim, out_dim, gamma=0.5)
    out = jax.block_until_ready(fwd(params, x))
    assert out.shape == (B, out_dim, W, H), out.shape
    assert bool(jnp.all(jnp.isfinite(out)))
    ref = reference_forward(params, x)
    max_err = float(jnp.max(jnp.abs(out - ref)))
    # Loose tolerance: kernel runs bf16 on the MXU (f32 accumulation) with an
    # approximate EUP reciprocal and bf16 output stores; ref is pure f32.
    assert max_err < 2.5e-1, max_err

    # --- gamma = 0 (torch's init): residual / conv1 path alone must match -------
    params0 = dict(params)
    params0["gamma"] = jnp.zeros((1, 1), jnp.float32)
    out0 = jax.block_until_ready(fwd(params0, x))
    ref0 = reference_forward(params0, x)
    max_err0 = float(jnp.max(jnp.abs(out0 - ref0)))
    assert max_err0 < 1.5e-1, max_err0

    print("KERNEL_OK")
</pallas_src>

<mosaic_0001>
module attributes {stable_mosaic.version = 11 : i64} {
  func.func @_self_attn1_kernel(%arg0: i32, %arg1: i32, %arg2: i32, %arg3: memref<1x128x64xbf16, #tpu.memory_space<vmem>>, %arg4: memref<1x128x64xbf16, #tpu.memory_space<vmem>>, %arg5: memref<64x256xbf16, #tpu.memory_space<vmem>>, %arg6: memref<64x256xbf16, #tpu.memory_space<vmem>>, %arg7: memref<1x256xf32, #tpu.memory_space<vmem>>, %arg8: memref<1x256xf32, #tpu.memory_space<vmem>>, %arg9: memref<1x1xf32, #tpu.memory_space<smem>>, %arg10: memref<1x128x128xbf16, #tpu.memory_space<vmem>>, %arg11: memref<128x128xbf16, #tpu.memory_space<vmem>>, %arg12: memref<128x128xf32, #tpu.memory_space<vmem>>, %arg13: memref<128x1xf32, #tpu.memory_space<vmem>>, %arg14: memref<128x1xf32, #tpu.memory_space<vmem>>, %arg15: memref<128x128xf32, #tpu.memory_space<vmem>>) attributes {dimension_semantics = [#tpu.dimension_semantics<parallel>, #tpu.dimension_semantics<parallel>, #tpu.dimension_semantics<arbitrary>], iteration_bounds = array<i64: 2, 2, 2>, scalar_prefetch = 0 : i64, scratch_operands = 5 : i64, tpu.core_type = #tpu.core_type<tc>, window_params = [{transform_indices = @transform_0, window_bounds = array<i64: 1, 128, 64>}, {transform_indices = @transform_1, window_bounds = array<i64: 1, 128, 64>}, {pipeline_mode = #tpu.pipeline_mode<synchronous>, transform_indices = @transform_2, window_bounds = array<i64: 64, 256>}, {pipeline_mode = #tpu.pipeline_mode<synchronous>, transform_indices = @transform_3, window_bounds = array<i64: 64, 256>}, {pipeline_mode = #tpu.pipeline_mode<synchronous>, transform_indices = @transform_4, window_bounds = array<i64: 1, 256>}, {pipeline_mode = #tpu.pipeline_mode<synchronous>, transform_indices = @transform_5, window_bounds = array<i64: 1, 256>}, {transform_indices = @transform_6, window_bounds = array<i64: 1, 1>}, {transform_indices = @transform_7, window_bounds = array<i64: 1, 128, 128>}]} {
    %c0_i32 = arith.constant 0 : i32
    %0 = arith.cmpi eq, %arg2, %c0_i32 : i32
    %1 = arith.extui %0 : i1 to i32
    %c0_i32_0 = arith.constant 0 : i32
    %2 = arith.cmpi ne, %1, %c0_i32_0 : i32
    scf.if %2 {
      %c0_26 = arith.constant 0 : index
      %c0_27 = arith.constant 0 : index
      %c0_28 = arith.constant 0 : index
      %42 = vector.load %arg3[%c0_26, %c0_27, %c0_28] : memref<1x128x64xbf16, #tpu.memory_space<vmem>>, vector<1x128x64xbf16>
      %43 = vector.shape_cast %42 : vector<1x128x64xbf16> to vector<128x64xbf16>
      %c0_29 = arith.constant 0 : index
      %c0_30 = arith.constant 0 : index
      %44 = vector.load %arg5[%c0_29, %c0_30] : memref<64x256xbf16, #tpu.memory_space<vmem>>, vector<64x256xbf16>
      %cst_31 = arith.constant dense<0.000000e+00> : vector<128x256xf32>
      %45 = tpu.matmul %43, %44, %cst_31 {dimension_numbers = #tpu.dot_dimension_numbers<[1], [0], [0], [1], [0, 0, 1, 1], [], []>} : vector<128x64xbf16>, vector<64x256xbf16>, vector<128x256xf32> -> vector<128x256xf32>
      %c0_32 = arith.constant 0 : index
      %c0_33 = arith.constant 0 : index
      %46 = vector.load %arg7[%c0_32, %c0_33] : memref<1x256xf32, #tpu.memory_space<vmem>>, vector<1x256xf32>
      %47 = vector.broadcast %46 : vector<1x256xf32> to vector<128x256xf32>
      %48 = arith.addf %45, %47 : vector<128x256xf32>
      %49 = vector.extract_strided_slice %48 {offsets = [0, 0], sizes = [128, 128], strides = [1, 1]} : vector<128x256xf32> to vector<128x128xf32>
      %50 = arith.truncf %49 : vector<128x128xf32> to vector<128x128xbf16>
      %c0_34 = arith.constant 0 : index
      %c0_35 = arith.constant 0 : index
      %51 = vector.load %arg11[%c0_34, %c0_35] : memref<128x128xbf16, #tpu.memory_space<vmem>>, vector<128x128xbf16>
      tpu.vector_store %arg11[%c0_34, %c0_35], %50 {strides = array<i32>} : memref<128x128xbf16, #tpu.memory_space<vmem>>, vector<128x128xbf16>,
      %52 = vector.extract_strided_slice %48 {offsets = [0, 128], sizes = [128, 128], strides = [1, 1]} : vector<128x256xf32> to vector<128x128xf32>
      %c0_36 = arith.constant 0 : index
      %c0_37 = arith.constant 0 : index
      %53 = vector.load %arg12[%c0_36, %c0_37] : memref<128x128xf32, #tpu.memory_space<vmem>>, vector<128x128xf32>
      tpu.vector_store %arg12[%c0_36, %c0_37], %52 {strides = array<i32>} : memref<128x128xf32, #tpu.memory_space<vmem>>, vector<128x128xf32>,
      %cst_38 = arith.constant 0xFF800000 : f32
      %54 = vector.broadcast %cst_38 : f32 to vector<128x1xf32>
      %c0_39 = arith.constant 0 : index
      %c0_40 = arith.constant 0 : index
      %55 = vector.load %arg13[%c0_39, %c0_40] : memref<128x1xf32, #tpu.memory_space<vmem>>, vector<128x1xf32>
      tpu.vector_store %arg13[%c0_39, %c0_40], %54 {strides = array<i32>} : memref<128x1xf32, #tpu.memory_space<vmem>>, vector<128x1xf32>,
      %cst_41 = arith.constant 0.000000e+00 : f32
      %56 = vector.broadcast %cst_41 : f32 to vector<128x1xf32>
      %c0_42 = arith.constant 0 : index
      %c0_43 = arith.constant 0 : index
      %57 = vector.load %arg14[%c0_42, %c0_43] : memref<128x1xf32, #tpu.memory_space<vmem>>, vector<128x1xf32>
      tpu.vector_store %arg14[%c0_42, %c0_43], %56 {strides = array<i32>} : memref<128x1xf32, #tpu.memory_space<vmem>>, vector<128x1xf32>,
      %cst_44 = arith.constant 0.000000e+00 : f32
      %58 = vector.broadcast %cst_44 : f32 to vector<128x128xf32>
      %c0_45 = arith.constant 0 : index
      %c0_46 = arith.constant 0 : index
      %59 = vector.load %arg15[%c0_45, %c0_46] : memref<128x128xf32, #tpu.memory_space<vmem>>, vector<128x128xf32>
      tpu.vector_store %arg15[%c0_45, %c0_46], %58 {strides = array<i32>} : memref<128x128xf32, #tpu.memory_space<vmem>>, vector<128x128xf32>,
    } else {
    }
    %c0 = arith.constant 0 : index
    %c0_1 = arith.constant 0 : index
    %c0_2 = arith.constant 0 : index
    %3 = vector.load %arg4[%c0, %c0_1, %c0_2] : memref<1x128x64xbf16, #tpu.memory_space<vmem>>, vector<1x128x64xbf16>
    %4 = vector.shape_cast %3 : vector<1x128x64xbf16> to vector<128x64xbf16>
    %c0_3 = arith.constant 0 : index
    %c0_4 = arith.constant 0 : index
    %5 = vector.load %arg6[%c0_3, %c0_4] : memref<64x256xbf16, #tpu.memory_space<vmem>>, vector<64x256xbf16>
    %cst = arith.constant dense<0.000000e+00> : vector<128x256xf32>
    %6 = tpu.matmul %4, %5, %cst {dimension_numbers = #tpu.dot_dimension_numbers<[1], [0], [0], [1], [0, 0, 1, 1], [], []>} : vector<128x64xbf16>, vector<64x256xbf16>, vector<128x256xf32> -> vector<128x256xf32>
    %c0_5 = arith.constant 0 : index
    %c0_6 = arith.constant 0 : index
    %7 = vector.load %arg8[%c0_5, %c0_6] : memref<1x256xf32, #tpu.memory_space<vmem>>, vector<1x256xf32>
    %8 = vector.broadcast %7 : vector<1x256xf32> to vector<128x256xf32>
    %9 = arith.addf %6, %8 : vector<128x256xf32>
    %10 = vector.extract_strided_slice %9 {offsets = [0, 0], sizes = [128, 128], strides = [1, 1]} : vector<128x256xf32> to vector<128x128xf32>
    %11 = arith.truncf %10 : vector<128x128xf32> to vector<128x128xbf16>
    %12 = vector.extract_strided_slice %9 {offsets = [0, 128], sizes = [128, 128], strides = [1, 1]} : vector<128x256xf32> to vector<128x128xf32>
    %13 = arith.truncf %12 : vector<128x128xf32> to vector<128x128xbf16>
    %c0_7 = arith.constant 0 : index
    %c0_8 = arith.constant 0 : index
    %14 = vector.load %arg11[%c0_7, %c0_8] : memref<128x128xbf16, #tpu.memory_space<vmem>>, vector<128x128xbf16>
    %cst_9 = arith.constant dense<0.000000e+00> : vector<128x128xf32>
    %15 = tpu.matmul %14, %11, %cst_9 {dimension_numbers = #tpu.dot_dimension_numbers<[1], [1], [0], [0], [0, 0, 1, 0], [], []>} : vector<128x128xbf16>, vector<128x128xbf16>, vector<128x128xf32> -> vector<128x128xf32>
    %c0_10 = arith.constant 0 : index
    %c0_11 = arith.constant 0 : index
    %16 = vector.load %arg13[%c0_10, %c0_11] : memref<128x1xf32, #tpu.memory_space<vmem>>, vector<128x1xf32>
    %cst_12 = arith.constant dense<0xFF800000> : vector<128xf32>
    %17 = vector.multi_reduction <maximumf>, %15, %cst_12 [1] : vector<128x128xf32> to vector<128xf32>
    %18 = vector.shape_cast %17 : vector<128xf32> to vector<128x1xf32>
    %19 = arith.maximumf %16, %18 : vector<128x1xf32>
    %20 = arith.subf %16, %19 : vector<128x1xf32>
    %21 = math.exp %20 : vector<128x1xf32>
    %22 = vector.broadcast %19 : vector<128x1xf32> to vector<128x128xf32>
    %23 = arith.subf %15, %22 : vector<128x128xf32>
    %24 = math.exp %23 : vector<128x128xf32>
    %c0_13 = arith.constant 0 : index
    %c0_14 = arith.constant 0 : index
    %25 = vector.load %arg14[%c0_13, %c0_14] : memref<128x1xf32, #tpu.memory_space<vmem>>, vector<128x1xf32>
    %26 = arith.mulf %21, %25 : vector<128x1xf32>
    %cst_15 = arith.constant dense<0.000000e+00> : vector<128xf32>
    %27 = vector.multi_reduction <add>, %24, %cst_15 [1] : vector<128x128xf32> to vector<128xf32>
    %28 = vector.shape_cast %27 : vector<128xf32> to vector<128x1xf32>
    %29 = arith.addf %26, %28 : vector<128x1xf32>
    %c0_16 = arith.constant 0 : index
    %c0_17 = arith.constant 0 : index
    %30 = vector.load %arg14[%c0_16, %c0_17] : memref<128x1xf32, #tpu.memory_space<vmem>>, vector<128x1xf32>
    tpu.vector_store %arg14[%c0_16, %c0_17], %29 {strides = array<i32>} : memref<128x1xf32, #tpu.memory_space<vmem>>, vector<128x1xf32>,
    %c0_18 = arith.constant 0 : index
    %c0_19 = arith.constant 0 : index
    %31 = vector.load %arg15[%c0_18, %c0_19] : memref<128x128xf32, #tpu.memory_space<vmem>>, vector<128x128xf32>
    %32 = vector.broadcast %21 : vector<128x1xf32> to vector<128x128xf32>
    %33 = arith.mulf %32, %31 : vector<128x128xf32>
    %34 = arith.truncf %24 : vector<128x128xf32> to vector<128x128xbf16>
    %cst_20 = arith.constant dense<0.000000e+00> : vector<128x128xf32>
    %35 = tpu.matmul %34, %13, %cst_20 {dimension_numbers = #tpu.dot_dimension_numbers<[1], [0], [0], [1], [0, 0, 1, 1], [], []>} : vector<128x128xbf16>, vector<128x128xbf16>, vector<128x128xf32> -> vector<128x128xf32>
    %36 = arith.addf %33, %35 : vector<128x128xf32>
    %c0_21 = arith.constant 0 : index
    %c0_22 = arith.constant 0 : index
    %37 = vector.load %arg15[%c0_21, %c0_22] : memref<128x128xf32, #tpu.memory_space<vmem>>, vector<128x128xf32>
    tpu.vector_store %arg15[%c0_21, %c0_22], %36 {strides = array<i32>} : memref<128x128xf32, #tpu.memory_space<vmem>>, vector<128x128xf32>,
    %c0_23 = arith.constant 0 : index
    %c0_24 = arith.constant 0 : index
    %38 = vector.load %arg13[%c0_23, %c0_24] : memref<128x1xf32, #tpu.memory_space<vmem>>, vector<128x1xf32>
    tpu.vector_store %arg13[%c0_23, %c0_24], %19 {strides = array<i32>} : memref<128x1xf32, #tpu.memory_space<vmem>>, vector<128x1xf32>,
    %c1_i32 = arith.constant 1 : i32
    %39 = arith.cmpi eq, %arg2, %c1_i32 : i32
    %40 = arith.extui %39 : i1 to i32
    %c0_i32_25 = arith.constant 0 : i32
    %41 = arith.cmpi ne, %40, %c0_i32_25 : i32
    scf.if %41 {
      %c0_26 = arith.constant 0 : index
      %c0_27 = arith.constant 0 : index
      %42 = vector.load %arg14[%c0_26, %c0_27] : memref<128x1xf32, #tpu.memory_space<vmem>>, vector<128x1xf32>
      %43 = tpu.reciprocal %42 {approx = true} : vector<128x1xf32> -> vector<128x1xf32>
      %c0_28 = arith.constant 0 : index
      %c0_29 = arith.constant 0 : index
      %44 = memref.load %arg9[%c0_28, %c0_29] : memref<1x1xf32, #tpu.memory_space<smem>>
      %c0_30 = arith.constant 0 : index
      %c0_31 = arith.constant 0 : index
      %45 = vector.load %arg15[%c0_30, %c0_31] : memref<128x128xf32, #tpu.memory_space<vmem>>, vector<128x128xf32>
      %46 = vector.broadcast %43 : vector<128x1xf32> to vector<128x128xf32>
      %47 = arith.mulf %45, %46 : vector<128x128xf32>
      %48 = vector.broadcast %44 : f32 to vector<128x128xf32>
      %49 = arith.mulf %48, %47 : vector<128x128xf32>
      %c0_32 = arith.constant 0 : index
      %c0_33 = arith.constant 0 : index
      %50 = vector.load %arg12[%c0_32, %c0_33] : memref<128x128xf32, #tpu.memory_space<vmem>>, vector<128x128xf32>
      %51 = arith.addf %49, %50 : vector<128x128xf32>
      %52 = arith.truncf %51 : vector<128x128xf32> to vector<128x128xbf16>
      %c0_34 = arith.constant 0 : index
      %c0_35 = arith.constant 0 : index
      %c0_36 = arith.constant 0 : index
      %53 = vector.load %arg10[%c0_34, %c0_35, %c0_36] : memref<1x128x128xbf16, #tpu.memory_space<vmem>>, vector<1x128x128xbf16>
      %54 = vector.shape_cast %53 : vector<1x128x128xbf16> to vector<128x128xbf16>
      %55 = vector.shape_cast %52 : vector<128x128xbf16> to vector<1x128x128xbf16>
      tpu.vector_store %arg10[%c0_34, %c0_35, %c0_36], %55 {strides = array<i32>} : memref<1x128x128xbf16, #tpu.memory_space<vmem>>, vector<1x128x128xbf16>,
    } else {
    }
    return
  }
  func.func @transform_0(%arg0: i32, %arg1: i32, %arg2: i32) -> (i32, i32, i32) {
    %c0_i32 = arith.constant 0 : i32
    %c0_i32_0 = arith.constant 0 : i32
    return %arg0, %arg1, %c0_i32 : i32, i32, i32
  }
  func.func @transform_1(%arg0: i32, %arg1: i32, %arg2: i32) -> (i32, i32, i32) {
    %c0_i32 = arith.constant 0 : i32
    %c0_i32_0 = arith.constant 0 : i32
    return %arg0, %arg2, %c0_i32 : i32, i32, i32
  }
  func.func @transform_2(%arg0: i32, %arg1: i32, %arg2: i32) -> (i32, i32) {
    %c0_i32 = arith.constant 0 : i32
    %c0_i32_0 = arith.constant 0 : i32
    %c0_i32_1 = arith.constant 0 : i32
    return %c0_i32, %c0_i32_0 : i32, i32
  }
  func.func @transform_3(%arg0: i32, %arg1: i32, %arg2: i32) -> (i32, i32) {
    %c0_i32 = arith.constant 0 : i32
    %c0_i32_0 = arith.constant 0 : i32
    %c0_i32_1 = arith.constant 0 : i32
    return %c0_i32, %c0_i32_0 : i32, i32
  }
  func.func @transform_4(%arg0: i32, %arg1: i32, %arg2: i32) -> (i32, i32) {
    %c0_i32 = arith.constant 0 : i32
    %c0_i32_0 = arith.constant 0 : i32
    %c0_i32_1 = arith.constant 0 : i32
    return %c0_i32, %c0_i32_0 : i32, i32
  }
  func.func @transform_5(%arg0: i32, %arg1: i32, %arg2: i32) -> (i32, i32) {
    %c0_i32 = arith.constant 0 : i32
    %c0_i32_0 = arith.constant 0 : i32
    %c0_i32_1 = arith.constant 0 : i32
    return %c0_i32, %c0_i32_0 : i32, i32
  }
  func.func @transform_6(%arg0: i32, %arg1: i32, %arg2: i32) -> (i32, i32) {
    %c0_i32 = arith.constant 0 : i32
    %c0_i32_0 = arith.constant 0 : i32
    %c0_i32_1 = arith.constant 0 : i32
    return %c0_i32, %c0_i32_0 : i32, i32
  }
  func.func @transform_7(%arg0: i32, %arg1: i32, %arg2: i32) -> (i32, i32, i32) {
    %c0_i32 = arith.constant 0 : i32
    %c0_i32_0 = arith.constant 0 : i32
    return %arg0, %arg1, %c0_i32 : i32, i32, i32
  }
}

</mosaic_0001>

<bundles_post_ra>
// kernel: self_attn1_forward.1
= control target key start
LH: loop header
LB: loop body
LE: loop exit
PB: predicated region body
PF: predicated region fallthrough
CT: control target
= control target key end

     0   :  { %s2641_s26 = smov 0   ;;  %s2643_s27 = smov 0   ;;  %s3285_s0 = inlined_call_operand.vmem [shape: bf16[2,256,64], index: 0, kind: input, shape index: {}, may-alias: {0,1}]   ;;  %s3286_s1 = inlined_call_operand.vmem [shape: bf16[2,256,64], index: 1, kind: input, shape index: {}, may-alias: {0,1}]   ;;  %s3287_s2 = inlined_call_operand.vmem [shape: bf16[64,256], index: 2, kind: input, shape index: {}]   ;;  %s3288_s3 = inlined_call_operand.vmem [shape: bf16[64,256], index: 3, kind: input, shape index: {}]   ;;  %s3289_s4 = inlined_call_operand.vmem [shape: f32[1,256], index: 4, kind: input, shape index: {}]   ;;  %s3290_s5 = inlined_call_operand.vmem [shape: f32[1,256], index: 5, kind: input, shape index: {}]   ;;  %s3291_s6 = inlined_call_operand.<no memory space> [shape: f32[1,1], index: 6, kind: input, shape index: {}]   ;;  %s3292_s7 = inlined_call_operand.vmem [shape: bf16[2,256,128], index: 7, kind: output, shape index: {}]  }
   0x1   :  { %12 = sst [smem:[#allocation7]] %s3291_s6  ;;  %s2645_s28 = smov 0  }
   0x2   :  { %s2647_s29 = smov 0   ;;  %s2649_s30 = smov 0  }
   0x3   :  { %s2651_s8 = smov 0   ;;  %s2653_s9 = smov 0  }
   0x4 LB: > { %s30_s6 = sadd.s32 1, %s2579_s29  ;;  %s33_s10 = sadd.s32 1, %s2583_s30  ;;  %s2591_s9 = sphi %s2653_s9, %s18_s9   ;;  %s2587_s8 = sphi %s2651_s8, %s3298_s8   ;;  %s2583_s30 = sphi %s2649_s30, %s3297_s30   ;;  %s2579_s29 = sphi %s2647_s29, %s3296_s29   ;;  %s2575_s28 = sphi %s2645_s28, %s3295_s28   ;;  %s2571_s27 = sphi %s2643_s27, %s3294_s27   ;;  %s2567_s26 = sphi %s2641_s26, %s3293_s26  }
   0x5   : > { %p31_p0 = scmp.ge.s32.totalorder %s30_s6, 2  ;;  %p2075_p1 = scmp.ge.s32.totalorder %s2591_s9, 1 }
   0x6   : > { %p283_p2 = scmp.lt.s32.totalorder %s2591_s9, 9  ;;  %s37_s11 = sadd.s32 1, %s2587_s8 }
   0x7   : > { %s3300_s6 = smov (%p31_p0, %s30_s6), 0  ;;  %s3302_s10 = smov (!%p31_p0, %s33_s10), %s2583_s30 }
   0x8   : > { %p284_p3 = pnand %p2075_p1, %p283_p2  ;;  %p35_p4 = scmp.ge.s32.totalorder %s3302_s10, 2 }
   0x9   : > { %s2076_s12 = sshll.u32 (!%p284_p3), %s2571_s27, 4  ;;  %p333_p6 = scmp.lt.s32.totalorder (!%p284_p3), %s2575_s28, 1 }
   0xa   : > { %s3304_s10 = smov (%p35_p4, %s3302_s10), 0  ;;  %s3306_s11 = smov (!%p35_p4, %s37_s11), %s2587_s8 }
   0xb   : > { %p39_p5 = scmp.ge.s32.totalorder %s3306_s11, 2  ;;  %287 = sbr.rel (%p284_p3) target bundleno = 1480 (0x5c8), region = 48 }
   0xc   : > { %p335_p7 = scmp.lt.s32.totalorder (!%p284_p3), %s2076_s12, 31  ;;  %s2079_s13 = sshll.u32 (!%p284_p3), %s2567_s26, 4 }
   0xd   : > { %s3308_s11 = smov (%p39_p5, %s3306_s11), 0  ;;  %p345_p8 = scmp.lt.s32.totalorder (!%p284_p3), %s2079_s13, 31 }
   0xe   : > { %p2085_p9 = scmp.ne.s32.totalorder (!%p284_p3), %s2567_s26, 0 }
  0x12   : > { %s3310_s28 = smov (!%p333_p6, %s2575_s28), 1  ;;  %s3312_s12 = smov (!%p335_p7, %s2076_s12), 31 }
  0x13   : > { %s2077_s14 = sshll.u32 %s3310_s28, 5  ;;  %s3314_s13 = smov (!%p345_p8, %s2079_s13), 31  ;;  %v2397_v0 = vld [vmem:[%s3287_s2 + $0x4] ss:$8 sps:$4 sm:$0xff] (!%p2085_p9)   ;;  %v2399_v1 = vld [vmem:[%s3287_s2] ss:$8 sps:$4 sm:$0xff] (!%p2085_p9)   ;;  %v393_v19 = vlaneseq (!%p2085_p9) }
  0x14   : > { %s338_s15 = sadd.s32 %s2077_s14, %s3312_s12  ;;  %s348_s23 = sadd.s32 %s2077_s14, %s3314_s13  ;;  %v2593_v2 = vmov (!%p2085_p9), 0   ;;  %508 = vmatprep.subr.bf16.mxu0 (!%p2085_p9), %v2397_v0  ;;  %2312 = vmatprep.subr.bf16.mxu1 (!%p2085_p9), %v2397_v0  ;;  %v2400_v3 = vld [vmem:[%s3287_s2 + $0x14] ss:$8 sps:$4 sm:$0xff] (!%p2085_p9)   ;;  %v2402_v4 = vld [vmem:[%s3287_s2 + $0x10] ss:$8 sps:$4 sm:$0xff] (!%p2085_p9)   ;;  %vm483_vm0 = vcmask (!%p2085_p9), 523264  }
  0x15   : > { %s2078_s16 = sshll.u32 %s338_s15, 2  ;;  %s2081_s24 = sshll.u32 %s348_s23, 2  ;;  %540 = vmatprep.mubr.bf16.mxu0 (!%p2085_p9), %v2593_v2  ;;  %580 = vmatprep.mubr.bf16.mxu1 (!%p2085_p9), %v2593_v2  ;;  %v2403_v5 = vld [vmem:[%s3287_s2 + $0x24] ss:$8 sps:$4 sm:$0xff] (!%p2085_p9)   ;;  %v2405_v6 = vld [vmem:[%s3287_s2 + $0x20] ss:$8 sps:$4 sm:$0xff] (!%p2085_p9)  }
  0x16   : > { %s2689_s19 = scalar_lea.vmem %s3285_s0, %s2078_s16  ;;  %s2694_s22 = scalar_lea.vmem %s3292_s7, %s2078_s16  ;;  %509 = vmatpush1.bf16.msra.mxu0 (!%p2085_p9), %v2399_v1  ;;  %2316 = vmatpush1.bf16.msra.mxu1 (!%p2085_p9), %v2399_v1  ;;  %v2406_v7 = vld [vmem:[%s3287_s2 + $0x34] ss:$8 sps:$4 sm:$0xff] (!%p2085_p9)   ;;  %v2408_v8 = vld [vmem:[%s3287_s2 + $0x30] ss:$8 sps:$4 sm:$0xff] (!%p2085_p9)   ;;  %vm653_vm1 = vcmask (!%p2085_p9), 7168   ;;  %v2594_v17 = vmov (!%p2085_p9), -inf  }
  0x17   : > { %s2699_s28 = scalar_lea.vmem %s3286_s1, %s2081_s24  ;;  %366 = sbr.rel (%p2085_p9) target bundleno = 280 (0x118), region = 52  ;;  %510 = vmatprep.subr.bf16.mxu0 (!%p2085_p9), %v2400_v3  ;;  %2313 = vmatprep.subr.bf16.mxu1 (!%p2085_p9), %v2400_v3  ;;  %v2409_v9 = vld [vmem:[%s2689_s19] sm:$0xff] (!%p2085_p9)   ;;  %v2411_v11 = vld [vmem:[%s2689_s19 + $0x8] sm:$0xff] (!%p2085_p9)   ;;  %v2413_v13 = vld [vmem:[%s2689_s19 + $0x10] sm:$0xff] (!%p2085_p9)   ;;  %654 = vst.msk [vmem:[#allocation4] sm:$0xff] (!%p2085_p9), %vm653_vm1, %v2594_v17  ;;  %v2595_v18 = vmov (!%p2085_p9), 0.0  }
  0x18   : > { %v2410_v10 = vld [vmem:[%s2689_s19 + $0x20] sm:$0xff] (!%p2085_p9)   ;;  %v2412_v12 = vld [vmem:[%s2689_s19 + $0x28] sm:$0xff] (!%p2085_p9)   ;;  %v2414_v14 = vld [vmem:[%s2689_s19 + $0x30] sm:$0xff] (!%p2085_p9)   ;;  %655 = vst.msk [vmem:[#allocation4 + $0x8] sm:$0xff] (!%p2085_p9), %vm653_vm1, %v2594_v17  ;;  %v394_v20 = vshrl.u32 (!%p2085_p9), %v393_v19, 7 }
  0x19   : > { %v2415_v15 = vld [vmem:[%s2689_s19 + $0x18] sm:$0xff] (!%p2085_p9)   ;;  %656 = vst.msk [vmem:[#allocation4 + $0x10] sm:$0xff] (!%p2085_p9), %vm653_vm1, %v2594_v17  ;;  %657 = vst.msk [vmem:[#allocation4 + $0x18] sm:$0xff] (!%p2085_p9), %vm653_vm1, %v2594_v17  ;;  %v391_v22 = vld [vmem:[%s3289_s4] sm:$0x3] (!%p2085_p9) }
  0x1a   : > { %511 = vmatpush1.bf16.msra.mxu0 (!%p2085_p9), %v2402_v4  ;;  %2317 = vmatpush1.bf16.msra.mxu1 (!%p2085_p9), %v2402_v4  ;;  %v2416_v16 = vld [vmem:[%s2689_s19 + $0x38] sm:$0xff] (!%p2085_p9)   ;;  %658 = vst.msk [vmem:[#allocation4 + $0x20] sm:$0xff] (!%p2085_p9), %vm653_vm1, %v2594_v17  ;;  %659 = vst.msk [vmem:[#allocation4 + $0x28] sm:$0xff] (!%p2085_p9), %vm653_vm1, %v2594_v17  ;;  %v399_v21 = vsub.s32 (!%p2085_p9), 1, %v394_v20  ;;  %v395_v23 = vsub.s32 (!%p2085_p9), 0, %v394_v20 }
  0x1b   : > { %512 = vmatprep.subr.bf16.mxu0 (!%p2085_p9), %v2403_v5  ;;  %2314 = vmatprep.subr.bf16.mxu1 (!%p2085_p9), %v2403_v5  ;;  %660 = vst.msk [vmem:[#allocation4 + $0x30] sm:$0xff] (!%p2085_p9), %vm653_vm1, %v2594_v17  ;;  %661 = vst.msk [vmem:[#allocation4 + $0x38] sm:$0xff] (!%p2085_p9), %vm653_vm1, %v2594_v17 }
  0x1c   : > { %662 = vst.msk [vmem:[#allocation4 + $0x40] sm:$0xff] (!%p2085_p9), %vm653_vm1, %v2594_v17  ;;  %663 = vst.msk [vmem:[#allocation4 + $0x48] sm:$0xff] (!%p2085_p9), %vm653_vm1, %v2594_v17  ;;  %v2777_v24 = vrot.slane (!%p2085_p9), %v391_v22, %v399_v21  ;;  %v2779_v25 = vrot.slane (!%p2085_p9), %v391_v22, %v395_v23 }
  0x1d   : > { %664 = vst.msk [vmem:[#allocation4 + $0x50] sm:$0xff] (!%p2085_p9), %vm653_vm1, %v2594_v17  ;;  %665 = vst.msk [vmem:[#allocation4 + $0x58] sm:$0xff] (!%p2085_p9), %vm653_vm1, %v2594_v17 }
  0x1e   : > { %513 = vmatpush1.bf16.msra.mxu0 %v2405_v6  ;;  %2318 = vmatpush1.bf16.msra.mxu1 %v2405_v6  ;;  %666 = vst.msk [vmem:[#allocation4 + $0x60] sm:$0xff] %vm653_vm1, %v2594_v17  ;;  %667 = vst.msk [vmem:[#allocation4 + $0x68] sm:$0xff] %vm653_vm1, %v2594_v17 }
  0x1f   : > { %514 = vmatprep.subr.bf16.mxu0 %v2406_v7  ;;  %2315 = vmatprep.subr.bf16.mxu1 %v2406_v7  ;;  %668 = vst.msk [vmem:[#allocation4 + $0x70] sm:$0xff] %vm653_vm1, %v2594_v17  ;;  %669 = vst.msk [vmem:[#allocation4 + $0x78] sm:$0xff] %vm653_vm1, %v2594_v17 }
  0x20   : > { %670 = vst.msk [vmem:[#allocation5] sm:$0xff] %vm653_vm1, %v2595_v18  ;;  %671 = vst.msk [vmem:[#allocation5 + $0x8] sm:$0xff] %vm653_vm1, %v2595_v18 }
  0x21   : > { %672 = vst.msk [vmem:[#allocation5 + $0x10] sm:$0xff] %vm653_vm1, %v2595_v18  ;;  %673 = vst.msk [vmem:[#allocation5 + $0x18] sm:$0xff] %vm653_vm1, %v2595_v18 }
  0x22   : > { %515 = vmatpush1.bf16.msra.mxu0 %v2408_v8  ;;  %2319 = vmatpush1.bf16.msra.mxu1 %v2408_v8  ;;  %674 = vst.msk [vmem:[#allocation5 + $0x20] sm:$0xff] %vm653_vm1, %v2595_v18  ;;  %675 = vst.msk [vmem:[#allocation5 + $0x28] sm:$0xff] %vm653_vm1, %v2595_v18 }
  0x23   : > { %676 = vst.msk [vmem:[#allocation5 + $0x30] sm:$0xff] %vm653_vm1, %v2595_v18  ;;  %677 = vst.msk [vmem:[#allocation5 + $0x38] sm:$0xff] %vm653_vm1, %v2595_v18 }
  0x24   : > { %678 = vst.msk [vmem:[#allocation5 + $0x40] sm:$0xff] %vm653_vm1, %v2595_v18  ;;  %679 = vst.msk [vmem:[#allocation5 + $0x48] sm:$0xff] %vm653_vm1, %v2595_v18 }
  0x25   : > { %2102 = vmatmul.mubr.msk.bf16.vlgmr.msra.gmra.mrb[0].mxu0 %vm483_vm0, %v2409_v9  ;;  %2106 = vmatmul.mubr.msk.bf16.vlgmr.msra.gmra.mrb[0].mxu1 %vm483_vm0, %v2410_v10  ;;  %680 = vst.msk [vmem:[#allocation5 + $0x50] sm:$0xff] %vm653_vm1, %v2595_v18  ;;  %681 = vst.msk [vmem:[#allocation5 + $0x58] sm:$0xff] %vm653_vm1, %v2595_v18 }
  0x26   : > { %550 = vmatprep.mubr.bf16.mxu0 %v2593_v2  ;;  %590 = vmatprep.mubr.bf16.mxu1 %v2593_v2  ;;  %682 = vst.msk [vmem:[#allocation5 + $0x60] sm:$0xff] %vm653_vm1, %v2595_v18  ;;  %683 = vst.msk [vmem:[#allocation5 + $0x68] sm:$0xff] %vm653_vm1, %v2595_v18 }
  0x27   : > { %684 = vst.msk [vmem:[#allocation5 + $0x70] sm:$0xff] %vm653_vm1, %v2595_v18  ;;  %685 = vst.msk [vmem:[#allocation5 + $0x78] sm:$0xff] %vm653_vm1, %v2595_v18 }
  0x28   : > { %686 = vst [vmem:[#allocation6] sm:$0xff] %v2595_v18  ;;  %687 = vst [vmem:[#allocation6 + $0x8] sm:$0xff] %v2595_v18 }
  0x29   : > { %688 = vst [vmem:[#allocation6 + $0x10] sm:$0xff] %v2595_v18  ;;  %689 = vst [vmem:[#allocation6 + $0x18] sm:$0xff] %v2595_v18 }
  0x2a   : > { %690 = vst [vmem:[#allocation6 + $0x20] sm:$0xff] %v2595_v18  ;;  %691 = vst [vmem:[#allocation6 + $0x28] sm:$0xff] %v2595_v18 }
  0x2b   : > { %692 = vst [vmem:[#allocation6 + $0x30] sm:$0xff] %v2595_v18  ;;  %693 = vst [vmem:[#allocation6 + $0x38] sm:$0xff] %v2595_v18 }
  0x2c   : > { %694 = vst [vmem:[#allocation6 + $0x40] sm:$0xff] %v2595_v18  ;;  %695 = vst [vmem:[#allocation6 + $0x48] sm:$0xff] %v2595_v18 }
  0x2d   : > { %2103 = vmatmul.mubr.msk.bf16.gmra.mrb[4].mxu0 %vm483_vm0, %v2411_v11  ;;  %2107 = vmatmul.mubr.msk.bf16.gmra.mrb[4].mxu1 %vm483_vm0, %v2412_v12  ;;  %696 = vst [vmem:[#allocation6 + $0x50] sm:$0xff] %v2595_v18  ;;  %697 = vst [vmem:[#allocation6 + $0x58] sm:$0xff] %v2595_v18 }
  0x2e   : > { %560 = vmatprep.mubr.bf16.mxu0 %v2593_v2  ;;  %600 = vmatprep.mubr.bf16.mxu1 %v2593_v2  ;;  %698 = vst [vmem:[#allocation6 + $0x60] sm:$0xff] %v2595_v18  ;;  %699 = vst [vmem:[#allocation6 + $0x68] sm:$0xff] %v2595_v18 }
  0x2f   : > { %700 = vst [vmem:[#allocation6 + $0x70] sm:$0xff] %v2595_v18  ;;  %701 = vst [vmem:[#allocation6 + $0x78] sm:$0xff] %v2595_v18 }
  0x35   : > { %2104 = vmatmul.mubr.msk.bf16.gmra.mrb[8].mxu0 %vm483_vm0, %v2413_v13  ;;  %2108 = vmatmul.mubr.msk.bf16.gmra.mrb[8].mxu1 %vm483_vm0, %v2414_v14 }
  0x36   : > { %570 = vmatprep.mubr.bf16.mxu0 %v2593_v2  ;;  %610 = vmatprep.mubr.bf16.mxu1 %v2593_v2 }
  0x3d   : > { %2105 = vmatmul.mubr.msk.bf16.gmra.mrb[12].mxu0 %vm483_vm0, %v2415_v15  ;;  %2109 = vmatmul.mubr.msk.bf16.gmra.mrb[12].mxu1 %vm483_vm0, %v2416_v16 }
  0xf8   : > { %v542_v26 = vpop.f32.mrb[0].mxu0  ;;  %v582_v27 = vpop.f32.mrb[0].mxu1 }
  0xf9   : > { %v544_v28 = vpop.f32.mrb[1].mxu0  ;;  %v584_v29 = vpop.f32.mrb[1].mxu1  ;;  %v543_v34 = vadd.f32 %v542_v26, %v2779_v25  ;;  %v583_v35 = vadd.f32 %v582_v27, %v2779_v25 }
  0xfa   : > { %v545_v30 = vadd.f32 %v544_v28, %v2777_v24  ;;  %v585_v31 = vadd.f32 %v584_v29, %v2777_v24  ;;  %v546_v32 = vpop.f32.mrb[2].mxu0  ;;  %v586_v33 = vpop.f32.mrb[2].mxu1 }
  0xfb   : > { %v547_v36 = vadd.f32 %v546_v32, %v2779_v25  ;;  %v587_v37 = vadd.f32 %v586_v33, %v2779_v25  ;;  %v548_v38 = vpop.f32.mrb[3].mxu0  ;;  %v588_v39 = vpop.f32.mrb[3].mxu1 }
  0xfc   : > { %637 = vst [vmem:[#allocation3] sm:$0xff] %v545_v30  ;;  %645 = vst [vmem:[#allocation3 + $0x40] sm:$0xff] %v585_v31  ;;  %v549_v40 = vadd.f32 %v548_v38, %v2777_v24  ;;  %v589_v41 = vadd.f32 %v588_v39, %v2777_v24 }
  0xfd   : > { %v621_v42 = vpack.c.bf16 %v547_v36, %v543_v34  ;;  %v625_v43 = vpack.c.bf16 %v587_v37, %v583_v35 }
  0xfe   : > { %638 = vst [vmem:[#allocation3 + $0x8] sm:$0xff] %v549_v40  ;;  %646 = vst [vmem:[#allocation3 + $0x48] sm:$0xff] %v589_v41 }
  0xff   : > { %629 = vst [vmem:[#allocation2] sm:$0xff] %v621_v42  ;;  %633 = vst [vmem:[#allocation2 + $0x20] sm:$0xff] %v625_v43 }
 0x100   : > { %v552_v44 = vpop.f32.mrb[4].mxu0  ;;  %v592_v45 = vpop.f32.mrb[4].mxu1 }
 0x101   : > { %v554_v46 = vpop.f32.mrb[5].mxu0  ;;  %v594_v47 = vpop.f32.mrb[5].mxu1  ;;  %v553_v52 = vadd.f32 %v552_v44, %v2779_v25  ;;  %v593_v53 = vadd.f32 %v592_v45, %v2779_v25 }
 0x102   : > { %v555_v48 = vadd.f32 %v554_v46, %v2777_v24  ;;  %v595_v49 = vadd.f32 %v594_v47, %v2777_v24  ;;  %v556_v50 = vpop.f32.mrb[6].mxu0  ;;  %v596_v51 = vpop.f32.mrb[6].mxu1 }
 0x103   : > { %v557_v54 = vadd.f32 %v556_v50, %v2779_v25  ;;  %v597_v55 = vadd.f32 %v596_v51, %v2779_v25  ;;  %v558_v56 = vpop.f32.mrb[7].mxu0  ;;  %v598_v57 = vpop.f32.mrb[7].mxu1 }
 0x104   : > { %639 = vst [vmem:[#allocation3 + $0x10] sm:$0xff] %v555_v48  ;;  %647 = vst [vmem:[#allocation3 + $0x50] sm:$0xff] %v595_v49  ;;  %v559_v58 = vadd.f32 %v558_v56, %v2777_v24  ;;  %v599_v59 = vadd.f32 %v598_v57, %v2777_v24 }
 0x105   : > { %v622_v60 = vpack.c.bf16 %v557_v54, %v553_v52  ;;  %v626_v61 = vpack.c.bf16 %v597_v55, %v593_v53 }
 0x106   : > { %640 = vst [vmem:[#allocation3 + $0x18] sm:$0xff] %v559_v58  ;;  %648 = vst [vmem:[#allocation3 + $0x58] sm:$0xff] %v599_v59 }
 0x107   : > { %630 = vst [vmem:[#allocation2 + $0x8] sm:$0xff] %v622_v60  ;;  %634 = vst [vmem:[#allocation2 + $0x28] sm:$0xff] %v626_v61 }
 0x108   : > { %v562_v62 = vpop.f32.mrb[8].mxu0  ;;  %v602_v63 = vpop.f32.mrb[8].mxu1 }
 0x109   : > { %v564_v0 = vpop.f32.mrb[9].mxu0  ;;  %v604_v1 = vpop.f32.mrb[9].mxu1  ;;  %v563_v6 = vadd.f32 %v562_v62, %v2779_v25  ;;  %v603_v7 = vadd.f32 %v602_v63, %v2779_v25 }
 0x10a   : > { %v565_v2 = vadd.f32 %v564_v0, %v2777_v24  ;;  %v605_v3 = vadd.f32 %v604_v1, %v2777_v24  ;;  %v566_v4 = vpop.f32.mrb[10].mxu0  ;;  %v606_v5 = vpop.f32.mrb[10].mxu1 }
 0x10b   : > { %v567_v8 = vadd.f32 %v566_v4, %v2779_v25  ;;  %v607_v9 = vadd.f32 %v606_v5, %v2779_v25  ;;  %v568_v10 = vpop.f32.mrb[11].mxu0  ;;  %v608_v11 = vpop.f32.mrb[11].mxu1 }
 0x10c   : > { %641 = vst [vmem:[#allocation3 + $0x20] sm:$0xff] %v565_v2  ;;  %649 = vst [vmem:[#allocation3 + $0x60] sm:$0xff] %v605_v3  ;;  %v569_v12 = vadd.f32 %v568_v10, %v2777_v24  ;;  %v609_v13 = vadd.f32 %v608_v11, %v2777_v24 }
 0x10d   : > { %v623_v14 = vpack.c.bf16 %v567_v8, %v563_v6  ;;  %v627_v15 = vpack.c.bf16 %v607_v9, %v603_v7 }
 0x10e   : > { %642 = vst [vmem:[#allocation3 + $0x28] sm:$0xff] %v569_v12  ;;  %650 = vst [vmem:[#allocation3 + $0x68] sm:$0xff] %v609_v13 }
 0x10f   : > { %631 = vst [vmem:[#allocation2 + $0x10] sm:$0xff] %v623_v14  ;;  %635 = vst [vmem:[#allocation2 + $0x30] sm:$0xff] %v627_v15 }
 0x110   : > { %v572_v16 = vpop.f32.mrb[12].mxu0  ;;  %v612_v17 = vpop.f32.mrb[12].mxu1 }
 0x111   : > { %v574_v18 = vpop.f32.mrb[13].mxu0  ;;  %v614_v19 = vpop.f32.mrb[13].mxu1  ;;  %v573_v26 = vadd.f32 %v572_v16, %v2779_v25  ;;  %v613_v27 = vadd.f32 %v612_v17, %v2779_v25 }
 0x112   : > { %v575_v20 = vadd.f32 %v574_v18, %v2777_v24  ;;  %v615_v21 = vadd.f32 %v614_v19, %v2777_v24  ;;  %v576_v22 = vpop.f32.mrb[14].mxu0  ;;  %v616_v23 = vpop.f32.mrb[14].mxu1 }
 0x113   : > { %v577_v28 = vadd.f32 %v576_v22, %v2779_v25  ;;  %v617_v29 = vadd.f32 %v616_v23, %v2779_v25  ;;  %v578_v30 = vpop.f32.mrb[15].mxu0  ;;  %v618_v31 = vpop.f32.mrb[15].mxu1 }
 0x114   : > { %643 = vst [vmem:[#allocation3 + $0x30] sm:$0xff] %v575_v20  ;;  %651 = vst [vmem:[#allocation3 + $0x70] sm:$0xff] %v615_v21  ;;  %v579_v32 = vadd.f32 %v578_v30, %v2777_v24  ;;  %v619_v33 = vadd.f32 %v618_v31, %v2777_v24 }
 0x115   : > { %v624_v34 = vpack.c.bf16 %v577_v28, %v573_v26  ;;  %v628_v35 = vpack.c.bf16 %v617_v29, %v613_v27 }
 0x116   : > { %644 = vst [vmem:[#allocation3 + $0x38] sm:$0xff] %v579_v32  ;;  %652 = vst [vmem:[#allocation3 + $0x78] sm:$0xff] %v619_v33 }
 0x117   : > { %632 = vst [vmem:[#allocation2 + $0x18] sm:$0xff] %v624_v34  ;;  %636 = vst [vmem:[#allocation2 + $0x38] sm:$0xff] %v628_v35 }
 0x118 PF: > { %v2419_v36 = vld [vmem:[%s3288_s3 + $0x4] ss:$8 sps:$4 sm:$0xff]   ;;  %v2421_v25 = vld [vmem:[%s3288_s3] ss:$8 sps:$4 sm:$0xff]   ;;  %v2596_v37 = vmov 0   ;;  %vm818_vm2 = vcmask 523264   ;;  %v728_v52 = vlaneseq }
 0x119   : > { %875 = vmatprep.mubr.bf16.mxu0 %v2596_v37  ;;  %2418 = vset.pattern.permute.xlu1 %v2596_v37  ;;  %v2422_v24 = vld [vmem:[%s3288_s3 + $0x14] ss:$8 sps:$4 sm:$0xff]   ;;  %v2424_v38 = vld [vmem:[%s3288_s3 + $0x10] ss:$8 sps:$4 sm:$0xff]   ;;  %v2425_v39 = vld [vmem:[%s3288_s3 + $0x24] ss:$8 sps:$4 sm:$0xff]  }
 0x11a   : > { %843 = vmatprep.subr.bf16.mxu0 %v2419_v36  ;;  %2417 = vset.pattern.permute.xlu0 %v2596_v37  ;;  %v2427_v40 = vld [vmem:[%s3288_s3 + $0x20] ss:$8 sps:$4 sm:$0xff]   ;;  %v2428_v41 = vld [vmem:[%s3288_s3 + $0x34] ss:$8 sps:$4 sm:$0xff]   ;;  %v2430_v42 = vld [vmem:[%s3288_s3 + $0x30] ss:$8 sps:$4 sm:$0xff]  }
 0x11b   : > { %844 = vmatpush1.bf16.msra.mxu0 %v2421_v25  ;;  %v2431_v43 = vld [vmem:[%s2699_s28] sm:$0xff]   ;;  %v2432_v44 = vld [vmem:[%s2699_s28 + $0x8] sm:$0xff]   ;;  %v2433_v45 = vld [vmem:[%s2699_s28 + $0x10] sm:$0xff]   ;;  %v729_v53 = vshrl.u32 %v728_v52, 7  ;;  %vm1397_vm3 = vcmask 7168   ;;  %p2134_p10 = scmp.ne.s32.totalorder %s2567_s26, 1 }
 0x11c   : > { %845 = vmatprep.subr.bf16.mxu0 %v2422_v24  ;;  %v2434_v46 = vld [vmem:[%s2699_s28 + $0x18] sm:$0xff]   ;;  %v2435_v47 = vld [vmem:[%s2699_s28 + $0x20] sm:$0xff]   ;;  %v2436_v48 = vld [vmem:[%s2699_s28 + $0x28] sm:$0xff]   ;;  %s1715_s26 = sld [smem:[#allocation7]] (!%p2134_p10) }
 0x11d   : > { %v2437_v49 = vld [vmem:[%s2699_s28 + $0x30] sm:$0xff]   ;;  %v2438_v50 = vld [vmem:[%s2699_s28 + $0x38] sm:$0xff]   ;;  %v972_v51 = vld [vmem:[#allocation2] sm:$0xff]  ;;  %v730_v54 = vsub.s32 0, %v729_v53  ;;  %v734_v56 = vsub.s32 1, %v729_v53 }
 0x11e   : > { %2264 = vmatprep.mubr.bf16.mxu1 %v972_v51  ;;  %v726_v55 = vld [vmem:[%s3290_s5] sm:$0x3] }
 0x11f   : > { %846 = vmatpush1.bf16.msra.mxu0 %v2424_v38  ;;  %v2856_v57 = vrot.slane %v726_v55, %v730_v54  ;;  %v2858_v59 = vrot.slane %v726_v55, %v734_v56 }
 0x120   : > { %847 = vmatprep.subr.bf16.mxu0 %v2425_v39 }
 0x123   : > { %848 = vmatpush1.bf16.msra.mxu0 %v2427_v40 }
 0x124   : > { %849 = vmatprep.subr.bf16.mxu0 %v2428_v41 }
 0x127   : > { %850 = vmatpush1.bf16.msra.mxu0 %v2430_v42 }
 0x12a   : > { %2126 = vmatmul.mubr.msk.bf16.vlgmr.msra.gmra.mrb[0].mxu0 %vm818_vm2, %v2431_v43 }
 0x12b   : > { %885 = vmatprep.mubr.bf16.mxu0 %v2596_v37 }
 0x132   : > { %2127 = vmatmul.mubr.msk.bf16.gmra.mrb[4].mxu0 %vm818_vm2, %v2432_v44 }
 0x133   : > { %895 = vmatprep.mubr.bf16.mxu0 %v2596_v37 }
 0x13a   : > { %2128 = vmatmul.mubr.msk.bf16.gmra.mrb[8].mxu0 %vm818_vm2, %v2433_v45 }
 0x13b   : > { %905 = vmatprep.mubr.bf16.mxu0 %v2596_v37 }
 0x142   : > { %2129 = vmatmul.mubr.msk.bf16.gmra.mrb[12].mxu0 %vm818_vm2, %v2434_v46 }
 0x143   : > { %915 = vmatprep.mubr.bf16.mxu0 %v2596_v37 }
 0x14a   : > { %2130 = vmatmul.mubr.msk.bf16.gmra.mrb[16].mxu0 %vm818_vm2, %v2435_v47 }
 0x14b   : > { %925 = vmatprep.mubr.bf16.mxu0 %v2596_v37 }
 0x152   : > { %2131 = vmatmul.mubr.msk.bf16.gmra.mrb[20].mxu0 %vm818_vm2, %v2436_v48 }
 0x153   : > { %935 = vmatprep.mubr.bf16.mxu0 %v2596_v37 }
 0x15a   : > { %2132 = vmatmul.mubr.msk.bf16.gmra.mrb[24].mxu0 %vm818_vm2, %v2437_v49 }
 0x15b   : > { %945 = vmatprep.mubr.bf16.mxu0 %v2596_v37 }
 0x162   : > { %2133 = vmatmul.mubr.msk.bf16.gmra.mrb[28].mxu0 %vm818_vm2, %v2438_v50 }
 0x1fd   : > { %v877_v58 = vpop.f32.mrb[0].mxu0 }
 0x1fe   : > { %v879_v60 = vpop.f32.mrb[1].mxu0  ;;  %v878_v62 = vadd.f32 %v877_v58, %v2856_v57 }
 0x1ff   : > { %v881_v61 = vpop.f32.mrb[2].mxu0  ;;  %v880_v1 = vadd.f32 %v879_v60, %v2858_v59 }
 0x200   : > { %v882_v63 = vadd.f32 %v881_v61, %v2856_v57  ;;  %v883_v0 = vpop.f32.mrb[3].mxu0 }
 0x201   : > { %v884_v2 = vadd.f32 %v883_v0, %v2858_v59 }
 0x202   : > { %v956_v3 = vpack.c.bf16 %v882_v63, %v878_v62 }
 0x203   : > { %v2864_v4 = vpack.c.bf16 %v884_v2, %v880_v1 }
 0x204   : > { %2248 = vmatprep.subr.bf16.mxu1 %v956_v3 }
 0x205   : > { %v887_v5 = vpop.f32.mrb[4].mxu0  ;;  %2249 = vmatpush3.bf16.xpose.msra.mxu1 %v956_v3  ;;  %2280 = vmatprep.subr.bf16.mxu0 %v2864_v4 }
 0x206   : > { %v889_v6 = vpop.f32.mrb[5].mxu0  ;;  %2281 = vmatpush3.bf16.msra.mxu0 %v2864_v4  ;;  %v888_v8 = vadd.f32 %v887_v5, %v2856_v57 }
 0x207   : > { %v891_v7 = vpop.f32.mrb[6].mxu0  ;;  %v890_v11 = vadd.f32 %v889_v6, %v2858_v59 }
 0x208   : > { %v892_v9 = vadd.f32 %v891_v7, %v2856_v57  ;;  %v893_v10 = vpop.f32.mrb[7].mxu0 }
 0x209   : > { %v894_v12 = vadd.f32 %v893_v10, %v2858_v59 }
 0x20a   : > { %v957_v13 = vpack.c.bf16 %v892_v9, %v888_v8 }
 0x20b   : > { %v2872_v14 = vpack.c.bf16 %v894_v12, %v890_v11 }
 0x20c   : > { %2250 = vmatprep.subr.bf16.mxu1 %v957_v13 }
 0x20d   : > { %v897_v15 = vpop.f32.mrb[8].mxu0  ;;  %2251 = vmatpush3.bf16.xpose.msra.mxu1 %v957_v13  ;;  %2282 = vmatprep.subr.bf16.mxu0 %v2872_v14 }
 0x20e   : > { %v899_v16 = vpop.f32.mrb[9].mxu0  ;;  %2283 = vmatpush3.bf16.msra.mxu0 %v2872_v14  ;;  %v898_v18 = vadd.f32 %v897_v15, %v2856_v57  ;;  %v973_v15 = vld [vmem:[#allocation2 + $0x8] sm:$0xff] }
 0x20f   : > { %v901_v17 = vpop.f32.mrb[10].mxu0  ;;  %v900_v21 = vadd.f32 %v899_v16, %v2858_v59  ;;  %v974_v16 = vld [vmem:[#allocation2 + $0x10] sm:$0xff] }
 0x210   : > { %v902_v19 = vadd.f32 %v901_v17, %v2856_v57  ;;  %v903_v20 = vpop.f32.mrb[11].mxu0  ;;  %v977_v17 = vld [vmem:[#allocation2 + $0x28] sm:$0xff] }
 0x211   : > { %v904_v22 = vadd.f32 %v903_v20, %v2858_v59 }
 0x212   : > { %v958_v23 = vpack.c.bf16 %v902_v19, %v898_v18 }
 0x213   : > { %v2880_v26 = vpack.c.bf16 %v904_v22, %v900_v21 }
 0x214   : > { %2252 = vmatprep.subr.bf16.mxu1 %v958_v23 }
 0x215   : > { %v907_v27 = vpop.f32.mrb[12].mxu0  ;;  %2253 = vmatpush3.bf16.xpose.msra.mxu1 %v958_v23  ;;  %2284 = vmatprep.subr.bf16.mxu0 %v2880_v26 }
 0x216   : > { %v909_v28 = vpop.f32.mrb[13].mxu0  ;;  %2285 = vmatpush3.bf16.msra.mxu0 %v2880_v26  ;;  %v908_v30 = vadd.f32 %v907_v27, %v2856_v57 }
 0x217   : > { %v911_v29 = vpop.f32.mrb[14].mxu0  ;;  %v910_v33 = vadd.f32 %v909_v28, %v2858_v59 }
 0x218   : > { %v912_v31 = vadd.f32 %v911_v29, %v2856_v57  ;;  %v913_v32 = vpop.f32.mrb[15].mxu0 }
 0x219   : > { %v914_v34 = vadd.f32 %v913_v32, %v2858_v59 }
 0x21a   : > { %v959_v35 = vpack.c.bf16 %v912_v31, %v908_v30 }
 0x21b   : > { %v2888_v36 = vpack.c.bf16 %v914_v34, %v910_v33 }
 0x21c   : > { %2254 = vmatprep.subr.bf16.mxu1 %v959_v35 }
 0x21d   : > { %v917_v25 = vpop.f32.mrb[16].mxu0  ;;  %2255 = vmatpush3.bf16.xpose.msra.mxu1 %v959_v35  ;;  %2286 = vmatprep.subr.bf16.mxu0 %v2888_v36 }
 0x21e   : > { %v919_v37 = vpop.f32.mrb[17].mxu0  ;;  %2287 = vmatpush3.bf16.msra.mxu0 %v2888_v36  ;;  %v918_v38 = vadd.f32 %v917_v25, %v2856_v57  ;;  %v1077_v25 = vld [vmem:[#allocation4] sm:$0xff] }
 0x21f   : > { %v921_v24 = vpop.f32.mrb[18].mxu0  ;;  %v920_v41 = vadd.f32 %v919_v37, %v2858_v59 }
 0x220   : > { %v922_v39 = vadd.f32 %v921_v24, %v2856_v57  ;;  %v923_v40 = vpop.f32.mrb[19].mxu0 }
 0x221   : > { %v924_v42 = vadd.f32 %v923_v40, %v2858_v59  ;;  %v2975_v40 = vld [vmem:[#allocation4 + $0x18] sm:$0xff] }
 0x222   : > { %v960_v43 = vpack.c.bf16 %v922_v39, %v918_v38 }
 0x223   : > { %v2896_v44 = vpack.c.bf16 %v924_v42, %v920_v41  ;;  %v2980_v41 = vld [vmem:[#allocation4 + $0x8] sm:$0xff] }
 0x224   : > { %2256 = vmatprep.subr.bf16.mxu1 %v960_v43 }
 0x225   : > { %v927_v45 = vpop.f32.mrb[20].mxu0  ;;  %2257 = vmatpush3.bf16.xpose.msra.mxu1 %v960_v43  ;;  %2288 = vmatprep.subr.bf16.mxu0 %v2896_v44 }
 0x226   : > { %v929_v46 = vpop.f32.mrb[21].mxu0  ;;  %2289 = vmatpush3.bf16.msra.mxu0 %v2896_v44  ;;  %v928_v48 = vadd.f32 %v927_v45, %v2856_v57 }
 0x227   : > { %v931_v47 = vpop.f32.mrb[22].mxu0  ;;  %v930_v51 = vadd.f32 %v929_v46, %v2858_v59  ;;  %v2988_v46 = vld [vmem:[#allocation4 + $0x30] sm:$0xff] }
 0x228   : > { %v932_v49 = vadd.f32 %v931_v47, %v2856_v57  ;;  %v933_v50 = vpop.f32.mrb[23].mxu0  ;;  %v2992_v47 = vld [vmem:[#allocation4 + $0x38] sm:$0xff] }
 0x229   : > { %v934_v52 = vadd.f32 %v933_v50, %v2858_v59 }
 0x22a   : > { %v961_v53 = vpack.c.bf16 %v932_v49, %v928_v48 }
 0x22b   : > { %v969_v54 = vpack.c.bf16 %v934_v52, %v930_v51  ;;  %v3001_v52 = vld [vmem:[#allocation4 + $0x20] sm:$0xff] }
 0x22c   : > { %2258 = vmatprep.subr.bf16.mxu1 %v961_v53 }
 0x22d   : > { %v937_v55 = vpop.f32.mrb[24].mxu0  ;;  %2259 = vmatpush3.bf16.xpose.msra.mxu1 %v961_v53  ;;  %2290 = vmatprep.subr.bf16.mxu0 %v969_v54  ;;  %v1082_v53 = vld [vmem:[#allocation4 + $0x28] sm:$0xff] }
 0x22e   : > { %v939_v56 = vpop.f32.mrb[25].mxu0  ;;  %2291 = vmatpush3.bf16.msra.mxu0 %v969_v54  ;;  %v938_v60 = vadd.f32 %v937_v55, %v2856_v57 }
 0x22f   : > { %v941_v58 = vpop.f32.mrb[26].mxu0  ;;  %v940_v63 = vadd.f32 %v939_v56, %v2858_v59 }
 0x230   : > { %v942_v61 = vadd.f32 %v941_v58, %v2856_v57  ;;  %v943_v62 = vpop.f32.mrb[27].mxu0 }
 0x231   : > { %v944_v0 = vadd.f32 %v943_v62, %v2858_v59 }
 0x232   : > { %v962_v1 = vpack.c.bf16 %v942_v61, %v938_v60  ;;  %v3011_v60 = vld [vmem:[#allocation4 + $0x50] sm:$0xff]  ;;  %v3015_v61 = vld [vmem:[#allocation4 + $0x58] sm:$0xff] }
 0x233   : > { %v970_v2 = vpack.c.bf16 %v944_v0, %v940_v63 }
 0x234   : > { %2260 = vmatprep.subr.bf16.mxu1 %v962_v1 }
 0x235   : > { %v947_v3 = vpop.f32.mrb[28].mxu0  ;;  %2261 = vmatpush3.bf16.xpose.msra.mxu1 %v962_v1  ;;  %2292 = vmatprep.subr.bf16.mxu0 %v970_v2 }
 0x236   : > { %v949_v5 = vpop.f32.mrb[29].mxu0  ;;  %2293 = vmatpush3.bf16.msra.mxu0 %v970_v2  ;;  %v948_v7 = vadd.f32 %v947_v3, %v2856_v57  ;;  %v3029_v3 = vld [vmem:[#allocation4 + $0x48] sm:$0xff] }
 0x237   : > { %v951_v6 = vpop.f32.mrb[30].mxu0  ;;  %v950_v10 = vadd.f32 %v949_v5, %v2858_v59 }
 0x238   : > { %v952_v8 = vadd.f32 %v951_v6, %v2856_v57  ;;  %v953_v9 = vpop.f32.mrb[31].mxu0  ;;  %v975_v57 = vld [vmem:[#allocation2 + $0x18] sm:$0xff] }
 0x239   : > { %v954_v11 = vadd.f32 %v953_v9, %v2858_v59  ;;  %v976_v59 = vld [vmem:[#allocation2 + $0x20] sm:$0xff] }
 0x23a   : > { %v963_v12 = vpack.c.bf16 %v952_v8, %v948_v7 }
 0x23b   : > { %v971_v13 = vpack.c.bf16 %v954_v11, %v950_v10  ;;  %v3039_v10 = vld [vmem:[#allocation4 + $0x60] sm:$0xff]  ;;  %v3043_v11 = vld [vmem:[#allocation4 + $0x78] sm:$0xff] }
 0x23c   : > { %2262 = vmatprep.subr.bf16.mxu1 %v963_v12 }
 0x23d   : > { %2263 = vmatpush3.bf16.xpose.msra.mxu1 %v963_v12  ;;  %2294 = vmatprep.subr.bf16.mxu0 %v971_v13 }
 0x23e   : > { %2320 = vmatprep.subr.bf16.mxu1 %v2864_v4  ;;  %2295 = vmatpush3.bf16.msra.mxu0 %v971_v13 }
 0x244   : > { %2265 = vmatmul.mubr.bf16.vlgmr.msra.gmra.mrb[0].mxu1 %v973_v15 }
 0x245   : > { %2328 = vmatpush3.bf16.msra.mxu1 %v2864_v4  ;;  %2268 = vmatprep.mubr.bf16.mxu1 %v974_v16  ;;  %v978_v4 = vld [vmem:[#allocation2 + $0x30] sm:$0xff] }
 0x246   : > { %2321 = vmatprep.subr.bf16.mxu1 %v2872_v14 }
 0x249   : > { %2329 = vmatpush3.bf16.msra.mxu1 %v2872_v14  ;;  %v979_v14 = vld [vmem:[#allocation2 + $0x38] sm:$0xff] }
 0x24a   : > { %2322 = vmatprep.subr.bf16.mxu1 %v2880_v26 }
 0x24c   : > { %2269 = vmatmul.mubr.bf16.gmra.mrb[4].mxu1 %v975_v57 }
 0x24d   : > { %2330 = vmatpush3.bf16.msra.mxu1 %v2880_v26  ;;  %2272 = vmatprep.mubr.bf16.mxu1 %v976_v59 }
 0x24e   : > { %2323 = vmatprep.subr.bf16.mxu1 %v2888_v36 }
 0x251   : > { %2331 = vmatpush3.bf16.msra.mxu1 %v2888_v36  ;;  %v2970_v36 = vld [vmem:[#allocation4 + $0x10] sm:$0xff] }
 0x252   : > { %2324 = vmatprep.subr.bf16.mxu1 %v2896_v44 }
 0x254   : > { %2273 = vmatmul.mubr.bf16.gmra.mrb[8].mxu1 %v977_v17  ;;  %v3053_v17 = vld [vmem:[#allocation4 + $0x70] sm:$0xff] }
 0x255   : > { %2332 = vmatpush3.bf16.msra.mxu1 %v2896_v44  ;;  %2276 = vmatprep.mubr.bf16.mxu1 %v978_v4 }
 0x256   : > { %2325 = vmatprep.subr.bf16.mxu1 %v969_v54 }
 0x259   : > { %2333 = vmatpush3.bf16.msra.mxu1 %v969_v54 }
 0x25a   : > { %2326 = vmatprep.subr.bf16.mxu1 %v970_v2 }
 0x25c   : > { %2277 = vmatmul.mubr.bf16.gmra.mrb[12].mxu1 %v979_v14  ;;  %v1090_v14 = vld [vmem:[#allocation4 + $0x68] sm:$0xff] }
 0x25d   : > { %2334 = vmatpush3.bf16.msra.mxu1 %v970_v2  ;;  %v3025_v2 = vld [vmem:[#allocation4 + $0x40] sm:$0xff] }
 0x25e   : > { %2327 = vmatprep.subr.bf16.mxu1 %v971_v13 }
 0x261   : > { %2335 = vmatpush3.bf16.msra.mxu1 %v971_v13 }
 0x317   : > { %v2922_v18 = vpop.f32.mrb[0].mxu1 }
 0x318   : > { %1097 = vmax.xlane.f32.xlu1 %v2922_v18  ;;  %v2925_v19 = vpop.f32.mrb[1].mxu1 }
 0x319   : > { %1093 = vmax.xlane.f32.xlu0 %v2925_v19  ;;  %v2928_v20 = vpop.f32.mrb[2].mxu1 }
 0x31a   : > { %v2930_v21 = vpop.f32.mrb[3].mxu1 }
 0x31c   : > { %1099 = vmax.xlane.f32.xlu1 %v2928_v20 }
 0x31d   : > { %1095 = vmax.xlane.f32.xlu0 %v2930_v21 }
 0x31f   : > { %v2934_v22 = vpop.f32.mrb[4].mxu1 }
 0x320   : > { %v2936_v23 = vpop.f32.mrb[5].mxu1 }
 0x321   : > { %1105 = vmax.xlane.f32.xlu0 %v2934_v22  ;;  %v2939_v26 = vpop.f32.mrb[6].mxu1 }
 0x322   : > { %1107 = vmax.xlane.f32.xlu1 %v2939_v26  ;;  %v2942_v27 = vpop.f32.mrb[7].mxu1 }
 0x325   : > { %1101 = vmax.xlane.f32.xlu0 %v2936_v23 }
 0x326   : > { %1103 = vmax.xlane.f32.xlu1 %v2942_v27 }
 0x327   : > { %v2946_v28 = vpop.f32.mrb[8].mxu1 }
 0x328   : > { %v2948_v29 = vpop.f32.mrb[9].mxu1 }
 0x329   : > { %v2950_v30 = vpop.f32.mrb[10].mxu1  ;;  %1113 = vmax.xlane.f32.xlu0 %v2946_v28 }
 0x32a   : > { %1115 = vmax.xlane.f32.xlu1 %v2950_v30  ;;  %v2954_v31 = vpop.f32.mrb[11].mxu1 }
 0x32d   : > { %1109 = vmax.xlane.f32.xlu0 %v2948_v29 }
 0x32e   : > { %1111 = vmax.xlane.f32.xlu1 %v2954_v31 }
 0x32f   : > { %v2958_v32 = vpop.f32.mrb[12].mxu1 }
 0x330   : > { %v2960_v33 = vpop.f32.mrb[13].mxu1 }
 0x331   : > { %v2962_v34 = vpop.f32.mrb[14].mxu1  ;;  %1117 = vmax.xlane.f32.xlu0 %v2960_v33 }
 0x332   : > { %1123 = vmax.xlane.f32.xlu1 %v2962_v34  ;;  %v2966_v35 = vpop.f32.mrb[15].mxu1 }
 0x335   : > { %1121 = vmax.xlane.f32.xlu0 %v2958_v32 }
 0x336   : > { %1119 = vmax.xlane.f32.xlu1 %v2966_v35 }
 0x3a5   : > { %v1098_v37 = vpop.xlane.xlu1 %1097 }
 0x3a6   : > { %v2973_v24 = vmax.f32 %v2970_v36, %v1098_v37  ;;  %v1094_v38 = vpop.xlane.xlu0 %1093 }
 0x3a7   : > { %v1125_v39 = vmax.f32 %v1077_v25, %v1094_v38 }
 0x3a8   : > { %1665 = vst.msk [vmem:[#allocation4 + $0x10] sm:$0xff] %vm1397_vm3, %v2973_v24  ;;  %1201 = vperm.xlu1 %2418, %v2973_v24  }
 0x3a9   : > { %1663 = vst.msk [vmem:[#allocation4] sm:$0xff] %vm1397_vm3, %v1125_v39  ;;  %v1100_v42 = vpop.xlane.xlu1 %1099  ;;  %1191 = vperm.xlu0 %2417, %v1125_v39   ;;  %v1141_v6 = vsub.f32 %v1077_v25, %v1125_v39 }
 0x3aa   : > { %v1128_v43 = vmax.f32 %v2975_v40, %v1100_v42  ;;  %v1096_v44 = vpop.xlane.xlu0 %1095 }
 0x3ab   : > { %v2985_v45 = vmax.f32 %v2980_v41, %v1096_v44  ;;  %v1157_v13 = vmul.f32 1.442695, %v1141_v6 }
 0x3ac   : > { %1666 = vst.msk [vmem:[#allocation4 + $0x18] sm:$0xff] %vm1397_vm3, %v1128_v43  ;;  %1206 = vperm.xlu1 %2418, %v1128_v43   ;;  %v1144_v15 = vsub.f32 %v2975_v40, %v1128_v43 }
 0x3ad   : > { %1664 = vst.msk [vmem:[#allocation4 + $0x8] sm:$0xff] %vm1397_vm3, %v2985_v45  ;;  %v1142_v4 = vsub.f32 %v2980_v41, %v2985_v45  ;;  %2439 = vpow2.f32 %v1157_v13  ;;  %v1143_v41 = vsub.f32 %v2970_v36, %v2973_v24 }
 0x3ae   : > { %v1106_v48 = vpop.xlane.xlu0 %1105  ;;  %v1163_v38 = vmul.f32 1.442695, %v1144_v15 }
 0x3af   : > { %v2995_v49 = vmax.f32 %v2988_v46, %v1106_v48  ;;  %v1108_v50 = vpop.xlane.xlu1 %1107  ;;  %v1159_v44 = vmul.f32 1.442695, %v1142_v4 }
 0x3b0   : > { %v2998_v51 = vmax.f32 %v2992_v47, %v1108_v50  ;;  %1196 = vperm.xlu1 %2418, %v2985_v45   ;;  %2441 = vpow2.f32 %v1163_v38 }
 0x3b1   : > { %1669 = vst.msk [vmem:[#allocation4 + $0x30] sm:$0xff] %vm1397_vm3, %v2995_v49  ;;  %2443 = vpow2.f32 %v1159_v44 }
 0x3b2   : > { %1670 = vst.msk [vmem:[#allocation4 + $0x38] sm:$0xff] %vm1397_vm3, %v2998_v51  ;;  %v1102_v54 = vpop.xlane.xlu0 %1101  ;;  %v1148_v48 = vsub.f32 %v2992_v47, %v2998_v51  ;;  %v1147_v47 = vsub.f32 %v2988_v46, %v2995_v49 }
 0x3b3   : > { %v3008_v55 = vmax.f32 %v3001_v52, %v1102_v54  ;;  %v1104_v56 = vpop.xlane.xlu1 %1103 }
 0x3b4   : > { %v1130_v58 = vmax.f32 %v1082_v53, %v1104_v56  ;;  %1221 = vperm.xlu1 %2418, %v2995_v49   ;;  %v1171_v24 = vmul.f32 1.442695, %v1148_v48 }
 0x3b5   : > { %1667 = vst.msk [vmem:[#allocation4 + $0x20] sm:$0xff] %vm1397_vm3, %v3008_v55  ;;  %v1145_v36 = vsub.f32 %v3001_v52, %v3008_v55 }
 0x3b6   : > { %1668 = vst.msk [vmem:[#allocation4 + $0x28] sm:$0xff] %vm1397_vm3, %v1130_v58  ;;  %v1114_v62 = vpop.xlane.xlu0 %1113  ;;  %v1146_v39 = vsub.f32 %v1082_v53, %v1130_v58  ;;  %v1161_v53 = vmul.f32 1.442695, %v1143_v41 }
 0x3b7   : > { %v3019_v63 = vmax.f32 %v3011_v60, %v1114_v62  ;;  %v1116_v0 = vpop.xlane.xlu1 %1115  ;;  %v3083_v56 = vpop.eup %2439 }
 0x3b8   : > { %v3022_v1 = vmax.f32 %v3015_v61, %v1116_v0  ;;  %1211 = vperm.xlu1 %2418, %v3008_v55   ;;  %v1167_v50 = vmul.f32 1.442695, %v1146_v39 }
 0x3b9   : > { %1673 = vst.msk [vmem:[#allocation4 + $0x50] sm:$0xff] %vm1397_vm3, %v3019_v63  ;;  %v1151_v62 = vsub.f32 %v3011_v60, %v3019_v63 }
 0x3ba   : > { %1674 = vst.msk [vmem:[#allocation4 + $0x58] sm:$0xff] %vm1397_vm3, %v3022_v1  ;;  %1246 = vperm.xlu0 %2417, %v3022_v1   ;;  %v1110_v5 = vpop.xlane.xlu0 %1109  ;;  %2445 = vpow2.f32 %v1167_v50  ;;  %v1152_v54 = vsub.f32 %v3015_v61, %v3022_v1  ;;  %v1169_v61 = vmul.f32 1.442695, %v1147_v47 }
 0x3bb   : > { %v3035_v7 = vmax.f32 %v3025_v2, %v1110_v5  ;;  %v1112_v8 = vpop.xlane.xlu1 %1111  ;;  %2447 = vpow2.f32 %v1161_v53 }
 0x3bc   : > { %v1134_v9 = vmax.f32 %v3029_v3, %v1112_v8  ;;  %1226 = vperm.xlu1 %2418, %v2998_v51   ;;  %v1165_v51 = vmul.f32 1.442695, %v1145_v36  ;;  %2449 = vpow2.f32 %v1171_v24  ;;  %v1179_v52 = vmul.f32 1.442695, %v1152_v54 }
 0x3bd   : > { %1671 = vst.msk [vmem:[#allocation4 + $0x40] sm:$0xff] %vm1397_vm3, %v3035_v7  ;;  %v1149_v5 = vsub.f32 %v3025_v2, %v3035_v7 }
 0x3be   : > { %1672 = vst.msk [vmem:[#allocation4 + $0x48] sm:$0xff] %vm1397_vm3, %v1134_v9  ;;  %1236 = vperm.xlu0 %2417, %v1134_v9   ;;  %v1118_v12 = vpop.xlane.xlu0 %1117  ;;  %v1150_v55 = vsub.f32 %v3029_v3, %v1134_v9  ;;  %2451 = vpow2.f32 %v1165_v51  ;;  %v1177_v3 = vmul.f32 1.442695, %v1151_v62 }
 0x3bf   : > { %v3048_v16 = vmax.f32 %v3039_v10, %v1118_v12  ;;  %v1124_v57 = vpop.xlane.xlu1 %1123  ;;  %2453 = vpow2.f32 %v1179_v52  ;;  %v1173_v8 = vmul.f32 1.442695, %v1149_v5 }
 0x3c0   : > { %v3051_v59 = vmax.f32 %v3043_v11, %v1124_v57  ;;  %1216 = vperm.xlu1 %2418, %v1130_v58   ;;  %v3090_v58 = vpop.eup %2441  ;;  %v1175_v46 = vmul.f32 1.442695, %v1150_v55  ;;  %2455 = vpow2.f32 %v1169_v61 }
 0x3c1   : > { %1675 = vst.msk [vmem:[#allocation4 + $0x60] sm:$0xff] %vm1397_vm3, %v3048_v16  ;;  %v3095_v0 = vpop.eup %2443  ;;  %v1153_v9 = vsub.f32 %v3039_v10, %v3048_v16 }
 0x3c2   : > { %v1156_v25 = vsub.f32 %v3043_v11, %v3051_v59  ;;  %1678 = vst.msk [vmem:[#allocation4 + $0x78] sm:$0xff] %vm1397_vm3, %v3051_v59  ;;  %v1122_v37 = vpop.xlane.xlu0 %1121  ;;  %2457 = vpow2.f32 %v1175_v46 }
 0x3c3   : > { %v3064_v40 = vmax.f32 %v3053_v17, %v1122_v37  ;;  %v1120_v42 = vpop.xlane.xlu1 %1119  ;;  %2459 = vpow2.f32 %v1177_v3 }
 0x3c4   : > { %v1138_v43 = vmax.f32 %v1090_v14, %v1120_v42  ;;  %1241 = vperm.xlu1 %2418, %v3019_v63   ;;  %v3098_v1 = vpop.eup %2445 }
 0x3c5   : > { %v1155_v45 = vsub.f32 %v3053_v17, %v3064_v40  ;;  %1677 = vst.msk [vmem:[#allocation4 + $0x70] sm:$0xff] %vm1397_vm3, %v3064_v40  ;;  %v3103_v6 = vpop.eup %2447 }
 0x3c6   : > { %1676 = vst.msk [vmem:[#allocation4 + $0x68] sm:$0xff] %vm1397_vm3, %v1138_v43  ;;  %1256 = vperm.xlu0 %2417, %v1138_v43   ;;  %v1154_v49 = vsub.f32 %v1090_v14, %v1138_v43  ;;  %v3106_v63 = vpop.eup %2449 }
 0x3c8   : > { %1231 = vperm.xlu1 %2418, %v3035_v7   ;;  %v1183_v60 = vmul.f32 1.442695, %v1154_v49  ;;  %v3111_v12 = vpop.eup %2451  ;;  %v1181_v7 = vmul.f32 1.442695, %v1153_v9 }
 0x3c9   : > { %v3114_v2 = vpop.eup %2453 }
 0x3ca   : > { %1266 = vperm.xlu0 %2417, %v3051_v59   ;;  %2461 = vpow2.f32 %v1183_v60  ;;  %v3117_v13 = vpop.eup %2455 }
 0x3cb   : > { %2463 = vpow2.f32 %v1173_v8 }
 0x3cc   : > { %1251 = vperm.xlu1 %2418, %v3048_v16   ;;  %v3120_v15 = vpop.eup %2457  ;;  %2465 = vpow2.f32 %v1181_v7 }
 0x3cd   : > { %v3123_v10 = vpop.eup %2459 }
 0x3ce   : > { %1432 = vperm.xlu0 %2417, %v3083_v56  }
 0x3d0   : > { %1261 = vperm.xlu1 %2418, %v3064_v40  }
 0x3d2   : > { %1447 = vperm.xlu0 %2417, %v3090_v58  }
 0x3d4   : > { %1437 = vperm.xlu1 %2418, %v3095_v0   ;;  %v3126_v16 = vpop.eup %2461 }
 0x3d5   : > { %v3129_v57 = vpop.eup %2463 }
 0x3d6   : > { %1457 = vperm.xlu0 %2417, %v3098_v1   ;;  %v3132_v4 = vpop.eup %2465 }
 0x3d8   : > { %1442 = vperm.xlu1 %2418, %v3103_v6  }
 0x3da   : > { %1467 = vperm.xlu0 %2417, %v3106_v63  }
 0x3dc   : > { %1452 = vperm.xlu1 %2418, %v3111_v12  }
 0x3de   : > { %1487 = vperm.xlu0 %2417, %v3114_v2  }
 0x3e0   : > { %1462 = vperm.xlu1 %2418, %v3117_v13  }
 0x3e2   : > { %1477 = vperm.xlu0 %2417, %v3120_v15  }
 0x3e4   : > { %1482 = vperm.xlu1 %2418, %v3123_v10  }
 0x3e6   : > { %1497 = vperm.xlu0 %2417, %v3126_v16  }
 0x3e8   : > { %1472 = vperm.xlu1 %2418, %v3129_v57  }
 0x3ec   : > { %1492 = vperm.xlu1 %2418, %v3132_v4  }
 0x427   : > { %v1202_v14 = vpop.permute.xlu1 %1201 }
 0x428   : > { %v1271_v37 = vsub.f32 %v2922_v18, %v1202_v14  ;;  %v1192_v38 = vpop.permute.xlu0 %1191 }
 0x429   : > { %v1269_v39 = vsub.f32 %v2925_v19, %v1192_v38 }
 0x42a   : > { %v1289_v42 = vmul.f32 1.442695, %v1271_v37 }
 0x42b   : > { %v1285_v43 = vmul.f32 1.442695, %v1269_v39  ;;  %v1207_v41 = vpop.permute.xlu1 %1206 }
 0x42c   : > { %2467 = vpow2.f32 %v1289_v42  ;;  %v1272_v44 = vsub.f32 %v2928_v20, %v1207_v41 }
 0x42d   : > { %2469 = vpow2.f32 %v1285_v43 }
 0x42e   : > { %v1291_v48 = vmul.f32 1.442695, %v1272_v44 }
 0x42f   : > { %v1197_v50 = vpop.permute.xlu1 %1196 }
 0x430   : > { %2471 = vpow2.f32 %v1291_v48  ;;  %v1270_v53 = vsub.f32 %v2930_v21, %v1197_v50 }
 0x432   : > { %v1287_v36 = vmul.f32 1.442695, %v1270_v53 }
 0x433   : > { %v1222_v24 = vpop.permute.xlu1 %1221 }
 0x434   : > { %2473 = vpow2.f32 %v1287_v36  ;;  %v1275_v18 = vsub.f32 %v2934_v22, %v1222_v24 }
 0x436   : > { %v2468_v54 = vpop.eup %2467  ;;  %v1297_v47 = vmul.f32 1.442695, %v1275_v18 }
 0x437   : > { %v2470_v19 = vpop.eup %2469  ;;  %1353 = vadd.xlane.f32.xlu0 %v2468_v54  ;;  %v1212_v51 = vpop.permute.xlu1 %1211 }
 0x438   : > { %2475 = vpow2.f32 %v1297_v47  ;;  %v1273_v52 = vsub.f32 %v2936_v23, %v1212_v51  ;;  %1349 = vadd.xlane.f32.xlu1 %v2470_v19 }
 0x439   : > { %v1247_v61 = vpop.permute.xlu0 %1246 }
 0x43a   : > { %v2472_v20 = vpop.eup %2471  ;;  %v1293_v55 = vmul.f32 1.442695, %v1273_v52  ;;  %v1280_v3 = vsub.f32 %v2950_v30, %v1247_v61 }
 0x43b   : > { %v1227_v62 = vpop.permute.xlu1 %1226  ;;  %v1527_v46 = vpack.c.bf16 %v2472_v20, %v2468_v54 }
 0x43c   : > { %2477 = vpow2.f32 %v1293_v55  ;;  %v1276_v21 = vsub.f32 %v2939_v26, %v1227_v62  ;;  %1355 = vadd.xlane.f32.xlu1 %v2472_v20  ;;  %v1307_v14 = vmul.f32 1.442695, %v1280_v3 }
 0x43d   : > { %v1237_v8 = vpop.permute.xlu0 %1236 }
 0x43e   : > { %v2474_v49 = vpop.eup %2473  ;;  %v1299_v22 = vmul.f32 1.442695, %v1276_v21  ;;  %v1278_v37 = vsub.f32 %v2954_v31, %v1237_v8 }
 0x43f   : > { %1351 = vadd.xlane.f32.xlu0 %v2474_v49  ;;  %v1217_v5 = vpop.permute.xlu1 %1216  ;;  %v1526_v60 = vpack.c.bf16 %v2474_v49, %v2470_v19 }
 0x440   : > { %2479 = vpow2.f32 %v1299_v22  ;;  %v1274_v23 = vsub.f32 %v2942_v27, %v1217_v5  ;;  %v1303_v41 = vmul.f32 1.442695, %v1278_v37  ;;  %v1185_v5 = vmul.f32 1.442695, %v1155_v45 }
 0x441   : > { %2296 = vmatprep.mubr.bf16.mxu0 %v1526_v60  ;;  %v1187_v60 = vmul.f32 1.442695, %v1156_v25 }
 0x442   : > { %v2476_v9 = vpop.eup %2475  ;;  %v1295_v7 = vmul.f32 1.442695, %v1274_v23  ;;  %2297 = vmatmul.mubr.bf16.vlgmr.msra.gmra.mrb[32].mxu0 %v1527_v46 }
 0x443   : > { %1361 = vadd.xlane.f32.xlu0 %v2476_v9  ;;  %v1242_v26 = vpop.permute.xlu1 %1241 }
 0x444   : > { %2481 = vpow2.f32 %v1295_v7  ;;  %v1279_v38 = vsub.f32 %v2946_v28, %v1242_v26 }
 0x445   : > { %v1257_v30 = vpop.permute.xlu0 %1256  ;;  %2483 = vpow2.f32 %v1307_v14 }
 0x446   : > { %v2478_v39 = vpop.eup %2477  ;;  %v1305_v42 = vmul.f32 1.442695, %v1279_v38  ;;  %v1282_v43 = vsub.f32 %v2966_v35, %v1257_v30 }
 0x447   : > { %1357 = vadd.xlane.f32.xlu0 %v2478_v39  ;;  %v1232_v27 = vpop.permute.xlu1 %1231 }
 0x448   : > { %2485 = vpow2.f32 %v1305_v42  ;;  %v1277_v44 = vsub.f32 %v2948_v29, %v1232_v27  ;;  %v1311_v31 = vmul.f32 1.442695, %v1282_v43  ;;  %v1317_v43 = vld [vmem:[#allocation5] sm:$0xff] }
 0x449   : > { %v1267_v48 = vpop.permute.xlu0 %1266  ;;  %2487 = vpow2.f32 %v1303_v41 }
 0x44a   : > { %v2480_v50 = vpop.eup %2479  ;;  %v1301_v53 = vmul.f32 1.442695, %v1277_v44  ;;  %v1284_v36 = vsub.f32 %v2962_v34, %v1267_v48  ;;  %v1333_v44 = vmul.f32 %v3083_v56, %v1317_v43 }
 0x44b   : > { %1363 = vadd.xlane.f32.xlu1 %v2480_v50  ;;  %v1252_v28 = vpop.permute.xlu1 %1251  ;;  %v1529_v24 = vpack.c.bf16 %v2480_v50, %v2476_v9 }
 0x44c   : > { %2489 = vpow2.f32 %v1301_v53  ;;  %v1315_v18 = vmul.f32 1.442695, %v1284_v36  ;;  %v1281_v35 = vsub.f32 %v2960_v33, %v1252_v28  ;;  %v1318_v28 = vld [vmem:[#allocation5 + $0x8] sm:$0xff] }
 0x44d   : > { %2491 = vpow2.f32 %v1311_v31  ;;  %v3163_v9 = vpop.permute.xlu0 %1432  ;;  %v1320_v31 = vld [vmem:[#allocation5 + $0x18] sm:$0xff] }
 0x44e   : > { %v2482_v54 = vpop.eup %2481  ;;  %v1309_v47 = vmul.f32 1.442695, %v1281_v35  ;;  %2493 = vpow2.f32 %v1315_v18  ;;  %v1336_v36 = vmul.f32 %v3090_v58, %v1320_v31  ;;  %v1334_v35 = vmul.f32 %v3095_v0, %v1318_v28  ;;  %v1331_v31 = vld [vmem:[#allocation5 + $0x70] sm:$0xff] }
 0x44f   : > { %1359 = vadd.xlane.f32.xlu1 %v2482_v54  ;;  %v1262_v29 = vpop.permute.xlu1 %1261  ;;  %v1528_v19 = vpack.c.bf16 %v2482_v54, %v2478_v39  ;;  %v2484_v52 = vpop.eup %2483  ;;  %v1319_v39 = vld [vmem:[#allocation5 + $0x10] sm:$0xff] }
 0x450   : > { %2495 = vpow2.f32 %v1309_v47  ;;  %v1283_v51 = vsub.f32 %v2958_v32, %v1262_v29  ;;  %v1335_v41 = vmul.f32 %v3103_v6, %v1319_v39  ;;  %v1323_v54 = vld [vmem:[#allocation5 + $0x30] sm:$0xff] }
 0x451   : > { %2300 = vmatprep.mubr.bf16.mxu0 %v1528_v19  ;;  %v3167_v40 = vpop.permute.xlu0 %1447  ;;  %v1339_v47 = vmul.f32 %v3117_v13, %v1323_v54  ;;  %v1321_v19 = vld [vmem:[#allocation5 + $0x20] sm:$0xff] }
 0x452   : > { %v2486_v34 = vpop.eup %2485  ;;  %v1313_v20 = vmul.f32 1.442695, %v1283_v51  ;;  %2301 = vmatmul.mubr.bf16.gmra.mrb[36].mxu0 %v1529_v24  ;;  %v1337_v58 = vmul.f32 %v3111_v12, %v1321_v19  ;;  %v1415_v19 = vld [vmem:[#allocation6 + $0x8] sm:$0xff] }
 0x453   : > { %1371 = vadd.xlane.f32.xlu1 %v2484_v52  ;;  %1369 = vadd.xlane.f32.xlu0 %v2486_v34  ;;  %v1531_v55 = vpack.c.bf16 %v2484_v52, %v2486_v34  ;;  %v2488_v33 = vpop.eup %2487  ;;  %v3165_v17 = vpop.permute.xlu1 %1437  ;;  %v1324_v34 = vld [vmem:[#allocation5 + $0x38] sm:$0xff] }
 0x454   : > { %2497 = vpow2.f32 %v1313_v20  ;;  %v1340_v0 = vmul.f32 %v3106_v63, %v1324_v34  ;;  %v1325_v63 = vld [vmem:[#allocation5 + $0x40] sm:$0xff] }
 0x455   : > { %2499 = vpow2.f32 %v1185_v5  ;;  %v3171_v7 = vpop.permute.xlu0 %1457  ;;  %v1326_v5 = vld [vmem:[#allocation5 + $0x48] sm:$0xff] }
 0x456   : > { %v2490_v61 = vpop.eup %2489  ;;  %2501 = vpow2.f32 %v1187_v60  ;;  %v1342_v43 = vmul.f32 %v3120_v15, %v1326_v5 }
 0x457   : > { %1367 = vadd.xlane.f32.xlu1 %v2488_v33  ;;  %1365 = vadd.xlane.f32.xlu0 %v2490_v61  ;;  %v1530_v62 = vpack.c.bf16 %v2488_v33, %v2490_v61  ;;  %v2492_v46 = vpop.eup %2491  ;;  %v3169_v45 = vpop.permute.xlu1 %1442  ;;  %v1322_v33 = vld [vmem:[#allocation5 + $0x28] sm:$0xff] }
 0x458   : > { %v2494_v21 = vpop.eup %2493  ;;  %v1338_v13 = vmul.f32 %v3098_v1, %v1322_v33  ;;  %v1341_v1 = vmul.f32 %v3129_v57, %v1325_v63 }
 0x459   : > { %2304 = vmatprep.mubr.bf16.mxu0 %v1530_v62  ;;  %v3175_v59 = vpop.permute.xlu0 %1467 }
 0x45a   : > { %v2496_v49 = vpop.eup %2495  ;;  %2305 = vmatmul.mubr.bf16.gmra.mrb[40].mxu0 %v1531_v55 }
 0x45b   : > { %1379 = vadd.xlane.f32.xlu1 %v2494_v21  ;;  %v1532_v32 = vpack.c.bf16 %v2492_v46, %v2496_v49  ;;  %v3173_v11 = vpop.permute.xlu1 %1452 }
 0x45d   : > { %2308 = vmatprep.mubr.bf16.mxu1 %v1532_v32  ;;  %v3179_v14 = vpop.permute.xlu0 %1487 }
 0x45e   : > { %v2498_v22 = vpop.eup %2497 }
 0x45f   : > { %1375 = vadd.xlane.f32.xlu1 %v2492_v46  ;;  %1377 = vadd.xlane.f32.xlu0 %v2498_v22  ;;  %v1533_v3 = vpack.c.bf16 %v2494_v21, %v2498_v22  ;;  %v3157_v8 = vpop.eup %2499  ;;  %v3177_v25 = vpop.permute.xlu1 %1462  ;;  %v1327_v46 = vld [vmem:[#allocation5 + $0x50] sm:$0xff]  ;;  %v1328_v21 = vld [vmem:[#allocation5 + $0x58] sm:$0xff] }
 0x460   : > { %v3160_v23 = vpop.eup %2501  ;;  %v1343_v12 = vmul.f32 %v3123_v10, %v1327_v46  ;;  %v1344_v32 = vmul.f32 %v3114_v2, %v1328_v21  ;;  %v1347_v57 = vmul.f32 %v3157_v8, %v1331_v31  ;;  %v1421_v46 = vld [vmem:[#allocation6 + $0x38] sm:$0xff]  ;;  %v1428_v31 = vld [vmem:[#allocation6 + $0x70] sm:$0xff] }
 0x461   : > { %2309 = vmatmul.mubr.bf16.vlgmr.msra.gmra.mrb[16].mxu1 %v1533_v3  ;;  %v3183_v26 = vpop.permute.xlu0 %1477 }
 0x463   : > { %1373 = vadd.xlane.f32.xlu0 %v2496_v49  ;;  %v3181_v37 = vpop.permute.xlu1 %1482 }
 0x465   : > { %v3187_v30 = vpop.permute.xlu0 %1497 }
 0x467   : > { %v3185_v38 = vpop.permute.xlu1 %1472 }
 0x46b   : > { %v3189_v42 = vpop.permute.xlu1 %1492 }
 0x470   : > { %1502 = vperm.xlu1 %2418, %v3157_v8   ;;  %v1417_v8 = vld [vmem:[#allocation6 + $0x18] sm:$0xff] }
 0x479   : > { %1507 = vperm.xlu0 %2417, %v3160_v23  }
 0x4c4   : > { %v1354_v27 = vpop.xlane.xlu0 %1353 }
 0x4c5   : > { %v1383_v48 = vadd.f32 %v1354_v27, %v1335_v41  ;;  %v1350_v50 = vpop.xlane.xlu1 %1349 }
 0x4c6   : > { %v1381_v53 = vadd.f32 %v1350_v50, %v1333_v44  ;;  %v1332_v44 = vld [vmem:[#allocation5 + $0x78] sm:$0xff] }
 0x4c7   : > { %1400 = vst.msk [vmem:[#allocation5 + $0x10] sm:$0xff] %vm1397_vm3, %v1383_v48  ;;  %v1348_v2 = vmul.f32 %v3160_v23, %v1332_v44 }
 0x4c8   : > { %1398 = vst.msk [vmem:[#allocation5] sm:$0xff] %vm1397_vm3, %v1381_v53  ;;  %v1330_v53 = vld [vmem:[#allocation5 + $0x68] sm:$0xff] }
 0x4c9   : > { %v1356_v24 = vpop.xlane.xlu1 %1355  ;;  %v1346_v15 = vmul.f32 %v3126_v16, %v1330_v53 }
 0x4ca   : > { %v1384_v18 = vadd.f32 %v1356_v24, %v1336_v36 }
 0x4cc   : > { %1401 = vst.msk [vmem:[#allocation5 + $0x18] sm:$0xff] %vm1397_vm3, %v1384_v18  ;;  %v1352_v6 = vpop.xlane.xlu0 %1351  ;;  %v1329_v18 = vld [vmem:[#allocation5 + $0x60] sm:$0xff] }
 0x4cd   : > { %v1382_v56 = vadd.f32 %v1352_v6, %v1334_v35  ;;  %v1345_v23 = vmul.f32 %v3132_v4, %v1329_v18 }
 0x4cf   : > { %1399 = vst.msk [vmem:[#allocation5 + $0x8] sm:$0xff] %vm1397_vm3, %v1382_v56 }
 0x4d0   : > { %v1362_v29 = vpop.xlane.xlu0 %1361 }
 0x4d1   : > { %v1387_v51 = vadd.f32 %v1362_v29, %v1339_v47  ;;  %v1416_v47 = vld [vmem:[#allocation6 + $0x10] sm:$0xff]  ;;  %v1414_v29 = vld [vmem:[#allocation6] sm:$0xff] }
 0x4d2   : > { %v1512_v16 = vmul.f32 %v3169_v45, %v1416_v47  ;;  %v1418_v45 = vld [vmem:[#allocation6 + $0x20] sm:$0xff] }
 0x4d3   : > { %1404 = vst.msk [vmem:[#allocation5 + $0x30] sm:$0xff] %vm1397_vm3, %v1387_v51  ;;  %v1510_v51 = vmul.f32 %v3163_v9, %v1414_v29  ;;  %v1419_v9 = vld [vmem:[#allocation6 + $0x28] sm:$0xff] }
 0x4d4   : > { %v1358_v52 = vpop.xlane.xlu0 %1357 }
 0x4d5   : > { %v1385_v20 = vadd.f32 %v1358_v52, %v1337_v58  ;;  %v1513_v52 = vmul.f32 %v3167_v40, %v1417_v8  ;;  %v1514_v40 = vmul.f32 %v3173_v11, %v1418_v45  ;;  %v1423_v11 = vld [vmem:[#allocation6 + $0x48] sm:$0xff] }
 0x4d7   : > { %1402 = vst.msk [vmem:[#allocation5 + $0x20] sm:$0xff] %vm1397_vm3, %v1385_v20 }
 0x4d8   : > { %v1364_v55 = vpop.xlane.xlu1 %1363 }
 0x4d9   : > { %v1388_v61 = vadd.f32 %v1364_v55, %v1340_v0  ;;  %v1511_v0 = vmul.f32 %v3165_v17, %v1415_v19  ;;  %v1517_v17 = vmul.f32 %v3175_v59, %v1421_v46 }
 0x4db   : > { %1405 = vst.msk [vmem:[#allocation5 + $0x38] sm:$0xff] %vm1397_vm3, %v1388_v61 }
 0x4dc   : > { %v1360_v62 = vpop.xlane.xlu1 %1359 }
 0x4dd   : > { %v1386_v49 = vadd.f32 %v1360_v62, %v1338_v13  ;;  %v1420_v62 = vld [vmem:[#allocation6 + $0x30] sm:$0xff] }
 0x4de   : > { %v1516_v21 = vmul.f32 %v3177_v25, %v1420_v62  ;;  %v1425_v25 = vld [vmem:[#allocation6 + $0x58] sm:$0xff] }
 0x4df   : > { %1403 = vst.msk [vmem:[#allocation5 + $0x28] sm:$0xff] %vm1397_vm3, %v1386_v49 }
 0x4e0   : > { %v1370_v22 = vpop.xlane.xlu0 %1369  ;;  %v1372_v3 = vpop.xlane.xlu1 %1371 }
 0x4e1   : > { %v1391_v60 = vadd.f32 %v1370_v22, %v1343_v12  ;;  %v1392_v39 = vadd.f32 %v1372_v3, %v1344_v32  ;;  %v1515_v22 = vmul.f32 %v3171_v7, %v1419_v9  ;;  %v1521_v7 = vmul.f32 %v3179_v14, %v1425_v25 }
 0x4e3   : > { %1408 = vst.msk [vmem:[#allocation5 + $0x50] sm:$0xff] %vm1397_vm3, %v1391_v60  ;;  %1409 = vst.msk [vmem:[#allocation5 + $0x58] sm:$0xff] %vm1397_vm3, %v1392_v39  ;;  %v1424_v39 = vld [vmem:[#allocation6 + $0x50] sm:$0xff] }
 0x4e4   : > { %v1366_v41 = vpop.xlane.xlu0 %1365  ;;  %v1368_v27 = vpop.xlane.xlu1 %1367 }
 0x4e5   : > { %v1389_v10 = vadd.f32 %v1366_v41, %v1341_v1  ;;  %v1390_v48 = vadd.f32 %v1368_v27, %v1342_v43  ;;  %v1422_v43 = vld [vmem:[#allocation6 + $0x40] sm:$0xff]  ;;  %v1520_v41 = vmul.f32 %v3181_v37, %v1424_v39  ;;  %v1429_v37 = vld [vmem:[#allocation6 + $0x78] sm:$0xff] }
 0x4e6   : > { %v1518_v59 = vmul.f32 %v3185_v38, %v1422_v43  ;;  %v1427_v38 = vld [vmem:[#allocation6 + $0x68] sm:$0xff] }
 0x4e7   : > { %1406 = vst.msk [vmem:[#allocation5 + $0x40] sm:$0xff] %vm1397_vm3, %v1389_v10  ;;  %1407 = vst.msk [vmem:[#allocation5 + $0x48] sm:$0xff] %vm1397_vm3, %v1390_v48  ;;  %v1519_v48 = vmul.f32 %v3183_v26, %v1423_v11 }
 0x4e8   : > { %v1380_v50 = vpop.xlane.xlu1 %1379 }
 0x4e9   : > { %v1396_v36 = vadd.f32 %v1380_v50, %v1348_v2 }
 0x4ea   : > { %v1694_v45 = vld [vmem:[#allocation5 + $0x58] sm:$0xff] (!%p2134_p10)  ;;  %v1693_v9 = vld [vmem:[#allocation5 + $0x50] sm:$0xff] (!%p2134_p10) }
 0x4eb   : > { %1413 = vst.msk [vmem:[#allocation5 + $0x78] sm:$0xff] %vm1397_vm3, %v1396_v36 }
 0x4ec   : > { %v1378_v28 = vpop.xlane.xlu0 %1377  ;;  %v1376_v24 = vpop.xlane.xlu1 %1375 }
 0x4ed   : > { %v1395_v35 = vadd.f32 %v1378_v28, %v1347_v57  ;;  %v1394_v6 = vadd.f32 %v1376_v24, %v1346_v15  ;;  %v1426_v15 = vld [vmem:[#allocation6 + $0x60] sm:$0xff] }
 0x4ee   : > { %v1522_v14 = vmul.f32 %v3189_v42, %v1426_v15  ;;  %v1683_v42 = vld [vmem:[#allocation5] sm:$0xff] (!%p2134_p10) }
 0x4ef   : > { %1412 = vst.msk [vmem:[#allocation5 + $0x70] sm:$0xff] %vm1397_vm3, %v1395_v35  ;;  %1411 = vst.msk [vmem:[#allocation5 + $0x68] sm:$0xff] %vm1397_vm3, %v1394_v6 }
 0x4f0   : > { %v1374_v54 = vpop.xlane.xlu0 %1373  ;;  %v1503_v53 = vpop.permute.xlu1 %1502 }
 0x4f1   : > { %v1393_v56 = vadd.f32 %v1374_v54, %v1345_v23  ;;  %v1524_v18 = vmul.f32 %v1503_v53, %v1428_v31  ;;  %v1523_v54 = vmul.f32 %v3187_v30, %v1427_v38  ;;  %v1684_v30 = vld [vmem:[#allocation5 + $0x8] sm:$0xff] (!%p2134_p10)  ;;  %v1845_v38 = vld [vmem:[#allocation3] sm:$0xff] (!%p2134_p10) }
 0x4f3   : > { %1410 = vst.msk [vmem:[#allocation5 + $0x60] sm:$0xff] %vm1397_vm3, %v1393_v56 }
 0x4f8   : > { %v1508_v24 = vpop.permute.xlu0 %1507 }
 0x4f9   : > { %v1525_v26 = vmul.f32 %v1508_v24, %v1429_v37 }
 0x515   : > { %v2298_v58 = vpop.f32.mrb[32].mxu0 }
 0x516   : > { %v1633_v34 = vadd.f32 %v2298_v58, %v1512_v16  ;;  %v1568_v20 = vpop.f32.mrb[33].mxu0  ;;  %v1685_v16 = vld [vmem:[#allocation5 + $0x10] sm:$0xff] (!%p2134_p10)  ;;  %v2597_v58 = vmov (!%p2134_p10), 0  }
 0x517   : > { %v1631_v4 = vadd.f32 %v1568_v20, %v1510_v51  ;;  %v2299_v55 = vpop.f32.mrb[34].mxu0  ;;  %v1686_v51 = vld [vmem:[#allocation5 + $0x18] sm:$0xff] (!%p2134_p10)  ;;  %2504 = vset.pattern.permute.xlu1 (!%p2134_p10), %v2597_v58  ;;  %2503 = vset.pattern.permute.xlu0 (!%p2134_p10), %v2597_v58  ;;  %2505 = vrcp.f32 (!%p2134_p10), %v1685_v16 }
 0x518   : > { %1649 = vst [vmem:[#allocation6 + $0x10] sm:$0xff] %v1633_v34  ;;  %v1634_v33 = vadd.f32 %v2299_v55, %v1513_v52  ;;  %v1571_v61 = vpop.f32.mrb[35].mxu0  ;;  %2507 = vrcp.f32 (!%p2134_p10), %v1683_v42  ;;  %v1688_v52 = vld [vmem:[#allocation5 + $0x28] sm:$0xff] (!%p2134_p10)  ;;  %v1687_v34 = vld [vmem:[#allocation5 + $0x20] sm:$0xff] (!%p2134_p10)  ;;  %v1690_v20 = vld [vmem:[#allocation5 + $0x38] sm:$0xff] (!%p2134_p10) }
 0x519   : > { %1647 = vst [vmem:[#allocation6] sm:$0xff] %v1631_v4  ;;  %v1632_v13 = vadd.f32 %v1571_v61, %v1511_v0  ;;  %2509 = vrcp.f32 (!%p2134_p10), %v1686_v51  ;;  %v1689_v0 = vld [vmem:[#allocation5 + $0x30] sm:$0xff] (!%p2134_p10) }
 0x51a   : > { %1650 = vst [vmem:[#allocation6 + $0x18] sm:$0xff] %v1634_v33  ;;  %2511 = vrcp.f32 (!%p2134_p10), %v1684_v30  ;;  %v1692_v33 = vld [vmem:[#allocation5 + $0x48] sm:$0xff] (!%p2134_p10)  ;;  %v1849_v30 = vld [vmem:[#allocation3 + $0x20] sm:$0xff] (!%p2134_p10) }
 0x51b   : > { %1648 = vst [vmem:[#allocation6 + $0x8] sm:$0xff] %v1632_v13  ;;  %2513 = vrcp.f32 (!%p2134_p10), %v1688_v52  ;;  %v1691_v13 = vld [vmem:[#allocation5 + $0x40] sm:$0xff] (!%p2134_p10) }
 0x51c   : > { %2515 = vrcp.f32 (!%p2134_p10), %v1687_v34 }
 0x51d   : > { %2517 = vrcp.f32 (!%p2134_p10), %v1690_v20 }
 0x51e   : > { %2519 = vrcp.f32 (!%p2134_p10), %v1689_v0 }
 0x51f   : > { %2521 = vrcp.f32 (!%p2134_p10), %v1692_v33  ;;  %v1718_v11 = vld [vmem:[#allocation6 + $0x10] sm:$0xff] (!%p2134_p10) }
 0x520   : > { %2523 = vrcp.f32 (!%p2134_p10), %v1691_v13  ;;  %v1852_v13 = vld [vmem:[#allocation3 + $0x38] sm:$0xff] (!%p2134_p10) }
 0x521   : > { %v2506_v4 = vpop.eup (!%p2134_p10), %2505  ;;  %2525 = vrcp.f32 (!%p2134_p10), %v1694_v45 }
 0x522   : > { %v2508_v55 = vpop.eup (!%p2134_p10), %2507  ;;  %1744 = vperm.xlu1 (!%p2134_p10), %2504, %v2506_v4   ;;  %2527 = vrcp.f32 (!%p2134_p10), %v1693_v9  ;;  %v1851_v9 = vld [vmem:[#allocation3 + $0x30] sm:$0xff] (!%p2134_p10) }
 0x523   : > { %v2510_v61 = vpop.eup (!%p2134_p10), %2509  ;;  %1734 = vperm.xlu0 (!%p2134_p10), %2503, %v2508_v55  }
 0x524   : > { %v2512_v62 = vpop.eup (!%p2134_p10), %2511 }
 0x525   : > { %v2302_v49 = vpop.f32.mrb[36].mxu0  ;;  %v2514_v46 = vpop.eup (!%p2134_p10), %2513 }
 0x526   : > { %v1637_v12 = vadd.f32 %v2302_v49, %v1516_v21  ;;  %v1584_v32 = vpop.f32.mrb[37].mxu0  ;;  %1749 = vperm.xlu1 (!%p2134_p10), %2504, %v2510_v61   ;;  %v2516_v21 = vpop.eup (!%p2134_p10), %2515 }
 0x527   : > { %v1635_v3 = vadd.f32 %v1584_v32, %v1514_v40  ;;  %v2303_v63 = vpop.f32.mrb[38].mxu0  ;;  %1739 = vperm.xlu0 (!%p2134_p10), %2503, %v2512_v62   ;;  %v1696_v40 = vld [vmem:[#allocation5 + $0x68] sm:$0xff] (!%p2134_p10)  ;;  %v2518_v49 = vpop.eup (!%p2134_p10), %2517  ;;  %v1698_v32 = vld [vmem:[#allocation5 + $0x78] sm:$0xff] (!%p2134_p10) }
 0x528   : > { %1653 = vst [vmem:[#allocation6 + $0x30] sm:$0xff] %v1637_v12  ;;  %v1638_v5 = vadd.f32 %v2303_v63, %v1517_v17  ;;  %v1587_v60 = vpop.f32.mrb[39].mxu0  ;;  %v1695_v17 = vld [vmem:[#allocation5 + $0x60] sm:$0xff] (!%p2134_p10)  ;;  %v2520_v12 = vpop.eup (!%p2134_p10), %2519  ;;  %2529 = vrcp.f32 (!%p2134_p10), %v1696_v40 }
 0x529   : > { %1651 = vst [vmem:[#allocation6 + $0x20] sm:$0xff] %v1635_v3  ;;  %v1636_v1 = vadd.f32 %v1587_v60, %v1515_v22  ;;  %2531 = vrcp.f32 (!%p2134_p10), %v1695_v17  ;;  %v2522_v22 = vpop.eup (!%p2134_p10), %2521  ;;  %v1697_v3 = vld [vmem:[#allocation5 + $0x70] sm:$0xff] (!%p2134_p10) }
 0x52a   : > { %1654 = vst [vmem:[#allocation6 + $0x38] sm:$0xff] %v1638_v5  ;;  %1759 = vperm.xlu1 (!%p2134_p10), %2504, %v2514_v46   ;;  %v2524_v63 = vpop.eup (!%p2134_p10), %2523  ;;  %2533 = vrcp.f32 (!%p2134_p10), %v1698_v32 }
 0x52b   : > { %1652 = vst [vmem:[#allocation6 + $0x28] sm:$0xff] %v1636_v1  ;;  %1754 = vperm.xlu0 (!%p2134_p10), %2503, %v2516_v21   ;;  %2535 = vrcp.f32 (!%p2134_p10), %v1697_v3  ;;  %v2526_v5 = vpop.eup (!%p2134_p10), %2525 }
 0x52c   : > { %v2528_v60 = vpop.eup (!%p2134_p10), %2527 }
 0x52d   : > { %v2306_v27 = vpop.f32.mrb[40].mxu0 }
 0x52e   : > { %v1641_v44 = vadd.f32 %v2306_v27, %v1520_v41  ;;  %v1600_v10 = vpop.f32.mrb[41].mxu0  ;;  %1769 = vperm.xlu1 (!%p2134_p10), %2504, %v2518_v49   ;;  %v1716_v41 = vld [vmem:[#allocation6] sm:$0xff] (!%p2134_p10) }
 0x52f   : > { %v1639_v2 = vadd.f32 %v1600_v10, %v1518_v59  ;;  %v2307_v50 = vpop.f32.mrb[42].mxu0  ;;  %1764 = vperm.xlu0 (!%p2134_p10), %2503, %v2520_v12   ;;  %v1722_v52 = vld [vmem:[#allocation6 + $0x30] sm:$0xff] (!%p2134_p10) }
 0x530   : > { %1657 = vst [vmem:[#allocation6 + $0x50] sm:$0xff] %v1641_v44  ;;  %v1642_v36 = vadd.f32 %v2307_v50, %v1521_v7  ;;  %v1603_v57 = vpop.f32.mrb[43].mxu0  ;;  %v3238_v44 = vstv (!%p2134_p10), %s1715_s26 }
 0x531   : > { %1655 = vst [vmem:[#allocation6 + $0x40] sm:$0xff] %v1639_v2  ;;  %v1640_v28 = vadd.f32 %v1603_v57, %v1519_v48  ;;  %v1719_v48 = vld [vmem:[#allocation6 + $0x18] sm:$0xff] (!%p2134_p10)  ;;  %v1717_v2 = vld [vmem:[#allocation6 + $0x8] sm:$0xff] (!%p2134_p10)  ;;  %v1847_v57 = vld [vmem:[#allocation3 + $0x10] sm:$0xff] (!%p2134_p10) }
 0x532   : > { %1658 = vst [vmem:[#allocation6 + $0x58] sm:$0xff] %v1642_v36  ;;  %1779 = vperm.xlu1 (!%p2134_p10), %2504, %v2522_v22   ;;  %v2530_v39 = vpop.eup (!%p2134_p10), %2529  ;;  %v1721_v24 = vld [vmem:[#allocation6 + $0x28] sm:$0xff] (!%p2134_p10)  ;;  %v1723_v42 = vld [vmem:[#allocation6 + $0x38] sm:$0xff] (!%p2134_p10) }
 0x533   : > { %1656 = vst [vmem:[#allocation6 + $0x48] sm:$0xff] %v1640_v28  ;;  %1774 = vperm.xlu0 (!%p2134_p10), %2503, %v2524_v63   ;;  %v2532_v1 = vpop.eup (!%p2134_p10), %2531  ;;  %v1848_v28 = vld [vmem:[#allocation3 + $0x18] sm:$0xff] (!%p2134_p10)  ;;  %v1854_v63 = vld [vmem:[#allocation3 + $0x48] sm:$0xff] (!%p2134_p10) }
 0x534   : > { %v2310_v35 = vpop.f32.mrb[16].mxu1  ;;  %1682 = sbr.rel (%p2134_p10) target bundleno = 1480 (0x5c8), region = 56  ;;  %v2534_v43 = vpop.eup (!%p2134_p10), %2533 }
 0x535   : > { %v1645_v6 = vadd.f32 %v2310_v35, %v1524_v18  ;;  %v1616_v23 = vpop.f32.mrb[17].mxu1  ;;  %v2536_v25 = vpop.eup (!%p2134_p10), %2535  ;;  %v1720_v35 = vld [vmem:[#allocation6 + $0x20] sm:$0xff] (!%p2134_p10) }
 0x536   : > { %v1643_v56 = vadd.f32 %v1616_v23, %v1522_v14  ;;  %v2311_v47 = vpop.f32.mrb[18].mxu1  ;;  %1789 = vperm.xlu1 (!%p2134_p10), %2504, %v2526_v5   ;;  %v1846_v14 = vld [vmem:[#allocation3 + $0x8] sm:$0xff] (!%p2134_p10) }
 0x537   : > { %1661 = vst [vmem:[#allocation6 + $0x70] sm:$0xff] %v1645_v6  ;;  %v1646_v29 = vadd.f32 %v2311_v47, %v1525_v26  ;;  %v1619_v8 = vpop.f32.mrb[19].mxu1  ;;  %1784 = vperm.xlu0 (!%p2134_p10), %2503, %v2528_v60  }
 0x538   : > { %1659 = vst [vmem:[#allocation6 + $0x60] sm:$0xff] %v1643_v56  ;;  %v1644_v19 = vadd.f32 %v1619_v8, %v1523_v54  ;;  %v1724_v21 = vld [vmem:[#allocation6 + $0x40] sm:$0xff] (!%p2134_p10) }
 0x539   : > { %1662 = vst [vmem:[#allocation6 + $0x78] sm:$0xff] %v1646_v29  ;;  %v1727_v60 = vld [vmem:[#allocation6 + $0x58] sm:$0xff] (!%p2134_p10) }
 0x53a   : > { %1660 = vst [vmem:[#allocation6 + $0x68] sm:$0xff] %v1644_v19  ;;  %1799 = vperm.xlu1 (!%p2134_p10), %2504, %v2530_v39   ;;  %v1850_v19 = vld [vmem:[#allocation3 + $0x28] sm:$0xff] (!%p2134_p10) }
 0x53b   : > { %1794 = vperm.xlu0 %2503, %v2532_v1   ;;  %v1725_v45 = vld [vmem:[#allocation6 + $0x48] sm:$0xff]  ;;  %v1853_v1 = vld [vmem:[#allocation3 + $0x40] sm:$0xff] }
 0x53e   : > { %1809 = vperm.xlu1 %2504, %v2534_v43   ;;  %v1726_v43 = vld [vmem:[#allocation6 + $0x50] sm:$0xff] }
 0x53f   : > { %1804 = vperm.xlu0 %2503, %v2536_v25  }
 0x5a1   : > { %v1745_v59 = vpop.permute.xlu1 %1744 }
 0x5a2   : > { %v1814_v27 = vmul.f32 %v1745_v59, %v1718_v11  ;;  %v1735_v7 = vpop.permute.xlu0 %1734 }
 0x5a3   : > { %v1812_v10 = vmul.f32 %v1735_v7, %v1716_v41 }
 0x5a4   : > { %v1831_v31 = vmul.f32 %v3238_v44, %v1814_v27 }
 0x5a5   : > { %v1750_v50 = vpop.permute.xlu1 %1749  ;;  %v1829_v15 = vmul.f32 %v3238_v44, %v1812_v10 }
 0x5a6   : > { %v1815_v53 = vmul.f32 %v1750_v50, %v1719_v48  ;;  %v1740_v36 = vpop.permute.xlu0 %1739  ;;  %v1863_v23 = vadd.f32 %v1847_v57, %v1831_v31  ;;  %v1856_v48 = vld [vmem:[#allocation3 + $0x58] sm:$0xff]  ;;  %v1729_v50 = vld [vmem:[#allocation6 + $0x68] sm:$0xff] }
 0x5a7   : > { %v1813_v37 = vmul.f32 %v1740_v36, %v1717_v2  ;;  %v1861_v29 = vadd.f32 %v1845_v38, %v1829_v15  ;;  %v1728_v36 = vld [vmem:[#allocation6 + $0x60] sm:$0xff] }
 0x5a8   : > { %v1832_v18 = vmul.f32 %v3238_v44, %v1815_v53  ;;  %v1855_v53 = vld [vmem:[#allocation3 + $0x50] sm:$0xff] }
 0x5a9   : > { %v1830_v26 = vmul.f32 %v3238_v44, %v1813_v37  ;;  %v1760_v6 = vpop.permute.xlu1 %1759 }
 0x5aa   : > { %v1864_v54 = vadd.f32 %v1848_v28, %v1832_v18  ;;  %v1817_v56 = vmul.f32 %v1760_v6, %v1721_v24  ;;  %v1755_v47 = vpop.permute.xlu0 %1754 }
 0x5ab   : > { %v1862_v8 = vadd.f32 %v1846_v14, %v1830_v26  ;;  %v1816_v16 = vmul.f32 %v1755_v47, %v1720_v35  ;;  %v1858_v14 = vld [vmem:[#allocation3 + $0x68] sm:$0xff]  ;;  %v1731_v26 = vld [vmem:[#allocation6 + $0x78] sm:$0xff] }
 0x5ac   : > { %v2177_v51 = vpack.c.bf16 %v1864_v54, %v1863_v23  ;;  %v1834_v58 = vmul.f32 %v3238_v44, %v1817_v56  ;;  %v1857_v23 = vld [vmem:[#allocation3 + $0x60] sm:$0xff]  ;;  %v1730_v54 = vld [vmem:[#allocation6 + $0x70] sm:$0xff] }
 0x5ad   : > { %v2172_v34 = vpack.c.bf16 %v1862_v8, %v1861_v29  ;;  %v1833_v20 = vmul.f32 %v3238_v44, %v1816_v16  ;;  %v1770_v0 = vpop.permute.xlu1 %1769 }
 0x5ae   : > { %2209 = vst [vmem:[%s2694_s22 + $0x8] sm:$0xff] %v2177_v51   ;;  %v1866_v4 = vadd.f32 %v1850_v19, %v1834_v58  ;;  %v1819_v55 = vmul.f32 %v1770_v0, %v1723_v42  ;;  %v1765_v33 = vpop.permute.xlu0 %1764  ;;  %v1860_v51 = vld [vmem:[#allocation3 + $0x78] sm:$0xff] }
 0x5af   : > { %2173 = vst [vmem:[%s2694_s22] sm:$0xff] %v2172_v34   ;;  %v1865_v61 = vadd.f32 %v1849_v30, %v1833_v20  ;;  %v1818_v62 = vmul.f32 %v1765_v33, %v1722_v52  ;;  %v1859_v52 = vld [vmem:[#allocation3 + $0x70] sm:$0xff] }
 0x5b0   : > { %v1836_v46 = vmul.f32 %v3238_v44, %v1819_v55 }
 0x5b1   : > { %v2182_v40 = vpack.c.bf16 %v1866_v4, %v1865_v61  ;;  %v1835_v49 = vmul.f32 %v3238_v44, %v1818_v62  ;;  %v1780_v17 = vpop.permute.xlu1 %1779 }
 0x5b2   : > { %v1868_v12 = vadd.f32 %v1852_v13, %v1836_v46  ;;  %v1821_v32 = vmul.f32 %v1780_v17, %v1725_v45  ;;  %v1775_v22 = vpop.permute.xlu0 %1774 }
 0x5b3   : > { %2210 = vst [vmem:[%s2694_s22 + $0x10] sm:$0xff] %v2182_v40   ;;  %v1867_v3 = vadd.f32 %v1851_v9, %v1835_v49  ;;  %v1820_v5 = vmul.f32 %v1775_v22, %v1724_v21 }
 0x5b4   : > { %v1838_v39 = vmul.f32 %v3238_v44, %v1821_v32 }
 0x5b5   : > { %v2187_v25 = vpack.c.bf16 %v1868_v12, %v1867_v3  ;;  %v1837_v11 = vmul.f32 %v3238_v44, %v1820_v5  ;;  %v1790_v41 = vpop.permute.xlu1 %1789 }
 0x5b6   : > { %v1870_v59 = vadd.f32 %v1854_v63, %v1838_v39  ;;  %v1823_v27 = vmul.f32 %v1790_v41, %v1727_v60  ;;  %v1785_v7 = vpop.permute.xlu0 %1784 }
 0x5b7   : > { %2211 = vst [vmem:[%s2694_s22 + $0x18] sm:$0xff] %v2187_v25   ;;  %v1869_v10 = vadd.f32 %v1853_v1, %v1837_v11  ;;  %v1822_v2 = vmul.f32 %v1785_v7, %v1726_v43 }
 0x5b8   : > { %v1840_v31 = vmul.f32 %v3238_v44, %v1823_v27 }
 0x5b9   : > { %v2192_v57 = vpack.c.bf16 %v1870_v59, %v1869_v10  ;;  %v1839_v15 = vmul.f32 %v3238_v44, %v1822_v2  ;;  %v1800_v28 = vpop.permute.xlu1 %1799 }
 0x5ba   : > { %v1872_v37 = vadd.f32 %v1856_v48, %v1840_v31  ;;  %v1825_v24 = vmul.f32 %v1800_v28, %v1729_v50  ;;  %v1795_v38 = vpop.permute.xlu0 %1794 }
 0x5bb   : > { %2212 = vst [vmem:[%s2694_s22 + $0x20] sm:$0xff] %v2192_v57   ;;  %v1871_v18 = vadd.f32 %v1855_v53, %v1839_v15  ;;  %v1824_v35 = vmul.f32 %v1795_v38, %v1728_v36 }
 0x5bc   : > { %v1842_v6 = vmul.f32 %v3238_v44, %v1825_v24 }
 0x5bd   : > { %v2197_v56 = vpack.c.bf16 %v1872_v37, %v1871_v18  ;;  %v1841_v47 = vmul.f32 %v3238_v44, %v1824_v35  ;;  %v1810_v29 = vpop.permute.xlu1 %1809 }
 0x5be   : > { %v1874_v8 = vadd.f32 %v1858_v14, %v1842_v6  ;;  %v1827_v19 = vmul.f32 %v1810_v29, %v1731_v26  ;;  %v1805_v16 = vpop.permute.xlu0 %1804 }
 0x5bf   : > { %2213 = vst [vmem:[%s2694_s22 + $0x28] sm:$0xff] %v2197_v56   ;;  %v1873_v42 = vadd.f32 %v1857_v23, %v1841_v47  ;;  %v1826_v58 = vmul.f32 %v1805_v16, %v1730_v54 }
 0x5c0   : > { %v1844_v30 = vmul.f32 %v3238_v44, %v1827_v19 }
 0x5c1   : > { %v2202_v34 = vpack.c.bf16 %v1874_v8, %v1873_v42  ;;  %v1843_v20 = vmul.f32 %v3238_v44, %v1826_v58 }
 0x5c2   : > { %v1876_v0 = vadd.f32 %v1860_v51, %v1844_v30 }
 0x5c3   : > { %2214 = vst [vmem:[%s2694_s22 + $0x30] sm:$0xff] %v2202_v34   ;;  %v1875_v4 = vadd.f32 %v1859_v52, %v1843_v20 }
 0x5c5   : > { %v2207_v55 = vpack.c.bf16 %v1876_v0, %v1875_v4 }
 0x5c7   : > { %2215 = vst [vmem:[%s2694_s22 + $0x38] sm:$0xff] %v2207_v55  }
 0x5c8 PF: > { %s18_s9 = sadd.s32 1, %s2591_s9   ;;  %s3293_s26 = smov %s2579_s29 }
 0x5c9   : > { %p15_p11 = scmp.ge.s32.totalorder %s18_s9, 10   ;;  %s3294_s27 = smov %s2583_s30 }
 0x5ca   : > { %s3295_s28 = smov %s2587_s8  ;;  %s3296_s29 = smov %s3300_s6 }
 0x5cb   : > { %s3297_s30 = smov %s3304_s10  ;;  %s3298_s8 = smov %s3308_s11 }
 0x5cc   :  { %17 = sbr.rel (!%p15_p11) target bundleno = 4 (0x4), region = 89 }

</bundles_post_ra>
